<compile_context>
chip_gen: v7x
topology: tpu7x:2x2x1
jax: 0.10.0
libtpu: 0.0.40
codegen_flags: <defaults>
</compile_context>

<pallas_src>
import jax
import jax.numpy as jnp
from jax import lax
from jax.experimental import pallas as pl
from jax.experimental.pallas import tpu as pltpu


def gru_kernel(x_ref, wih_ref, whh_r_ref, whh_z_ref, whh_n_ref,
               bg_ref, bhn_ref, out_ref):
    """Whole-sequence GRU in a single invocation.

    x_ref    : (B, T, F)   noise input, batch-first
    wih_ref  : (F, 3H)     W_ih^T, gate columns ordered [r | z | n]
    whh_*_ref: (H, H)      per-gate W_hh_gate^T
    bg_ref   : (1, 3H)     [b_ih_r+b_hh_r | b_ih_z+b_hh_z | b_ih_n]
    bhn_ref  : (1, H)      b_hh_n (must stay inside r * (...))
    out_ref  : (B, T*H)    hidden states, time-major along lanes
    """
    B, T, F = x_ref.shape
    H = whh_r_ref.shape[0]

    # --- Hoisted input projection: one batched matmul for all timesteps ----
    x2 = x_ref[...].reshape(B * T, F)                                 # (B*T, F)
    gi = jnp.dot(x2, wih_ref[...],
                 preferred_element_type=jnp.float32) + bg_ref[...]    # (B*T, 3H)
    gi = gi.reshape(B, T, 3 * H)
    gi_r = gi[:, :, 0:H]          # each (B, T, H); sliced once, outside loop
    gi_z = gi[:, :, H:2 * H]
    gi_n = gi[:, :, 2 * H:3 * H]

    whh_r = whh_r_ref[...]
    whh_z = whh_z_ref[...]
    whh_n = whh_n_ref[...]
    bhn = bhn_ref[...]

    # --- Sequential recurrence, fully unrolled (T is small and static) -----
    h = jnp.zeros((B, H), jnp.float32)
    outs = []
    for t in range(T):
        hr = jnp.dot(h, whh_r, preferred_element_type=jnp.float32)
        hz = jnp.dot(h, whh_z, preferred_element_type=jnp.float32)
        hn = jnp.dot(h, whh_n, preferred_element_type=jnp.float32) + bhn
        r = jax.nn.sigmoid(gi_r[:, t, :] + hr)
        z = jax.nn.sigmoid(gi_z[:, t, :] + hz)
        n = jnp.tanh(gi_n[:, t, :] + r * hn)
        h = (1.0 - z) * n + z * h
        outs.append(h)

    # Single lane-dense store of the whole output slab.
    out_ref[...] = jnp.concatenate(outs, axis=-1)                     # (B, T*H)


@jax.jit
def noise_encoder_gru(noise_btf, w_ih, w_hh, b_ih, b_hh):
    """noise_btf: (B, T, F) float32; weights in PyTorch layout:
       w_ih (3H, F), w_hh (3H, H), b_ih (3H,), b_hh (3H,). Returns (B, T, H)."""
    B, T, F = noise_btf.shape
    H = w_hh.shape[1]

    x = jnp.asarray(noise_btf, jnp.float32)
    w_ih = jnp.asarray(w_ih, jnp.float32)
    w_hh = jnp.asarray(w_hh, jnp.float32)
    b_ih = jnp.asarray(b_ih, jnp.float32)
    b_hh = jnp.asarray(b_hh, jnp.float32)

    wih_T = w_ih.T                                        # (F, 3H), cols r|z|n
    whh_r = w_hh[0:H].T                                   # (H, H)
    whh_z = w_hh[H:2 * H].T
    whh_n = w_hh[2 * H:3 * H].T

    # Folded biases: r/z get b_ih+b_hh; n gets only b_ih (b_hh_n stays in-loop).
    bg = jnp.concatenate([b_ih[0:H] + b_hh[0:H],
                          b_ih[H:2 * H] + b_hh[H:2 * H],
                          b_ih[2 * H:3 * H]]).reshape(1, 3 * H)
    bhn = b_hh[2 * H:3 * H].reshape(1, H)

    out_flat = pl.pallas_call(
        gru_kernel,
        out_shape=jax.ShapeDtypeStruct((B, T * H), jnp.float32),
        grid=(1,),
        in_specs=[
            pl.BlockSpec((B, T, F), lambda i: (0, 0, 0)),
            pl.BlockSpec((F, 3 * H), lambda i: (0, 0)),
            pl.BlockSpec((H, H), lambda i: (0, 0)),
            pl.BlockSpec((H, H), lambda i: (0, 0)),
            pl.BlockSpec((H, H), lambda i: (0, 0)),
            pl.BlockSpec((1, 3 * H), lambda i: (0, 0)),
            pl.BlockSpec((1, H), lambda i: (0, 0)),
        ],
        out_specs=pl.BlockSpec((B, T * H), lambda i: (0, 0)),
        compiler_params=pltpu.CompilerParams(
            dimension_semantics=("arbitrary",)),
    )(x, wih_T, whh_r, whh_z, whh_n, bg, bhn)

    return out_flat.reshape(B, T, H)


def gru_reference(noise_btf, w_ih, w_hh, b_ih, b_hh):
    """Pure-JAX reference matching torch.nn.GRU (batch_first, 1 layer, h0=0)."""
    B, T, F = noise_btf.shape
    H = w_hh.shape[1]
    wih_T, whh_T = w_ih.T, w_hh.T

    def step(h, x_t):
        gi = x_t @ wih_T + b_ih
        gh = h @ whh_T + b_hh
        i_r, i_z, i_n = gi[:, :H], gi[:, H:2 * H], gi[:, 2 * H:]
        h_r, h_z, h_n = gh[:, :H], gh[:, H:2 * H], gh[:, 2 * H:]
        r = jax.nn.sigmoid(i_r + h_r)
        z = jax.nn.sigmoid(i_z + h_z)
        n = jnp.tanh(i_n + r * h_n)
        h_new = (1.0 - z) * n + z * h
        return h_new, h_new

    h0 = jnp.zeros((B, H), jnp.float32)
    _, out_tbh = lax.scan(step, h0, jnp.transpose(noise_btf, (1, 0, 2)))
    return jnp.transpose(out_tbh, (1, 0, 2))


if __name__ == "__main__":
    # Module config: features_len = 10 (fixed), hidden_size = latent_dim_noise
    FEATURES_LEN = 10
    HIDDEN = 32           # hparams['latent_dim_noise']
    BATCH = 2
    NUM_FRAMES = 8

    key = jax.random.PRNGKey(0)
    k_noise, k_wih, k_whh, k_bih, k_bhh = jax.random.split(key, 5)

    # Deterministic parameter init, PyTorch-style U(-1/sqrt(H), 1/sqrt(H))
    bound = 1.0 / jnp.sqrt(jnp.float32(HIDDEN))
    w_ih = jax.random.uniform(k_wih, (3 * HIDDEN, FEATURES_LEN), jnp.float32, -bound, bound)
    w_hh = jax.random.uniform(k_whh, (3 * HIDDEN, HIDDEN), jnp.float32, -bound, bound)
    b_ih = jax.random.uniform(k_bih, (3 * HIDDEN,), jnp.float32, -bound, bound)
    b_hh = jax.random.uniform(k_bhh, (3 * HIDDEN,), jnp.float32, -bound, bound)

    # forward(batch_size, num_frames): noise ~ N(0, 1)
    # TODO(synk): noise could be generated in-kernel with pltpu.prng_seed +
    # stateful_normal, but that changes the random stream vs jax.random, so it
    # stays in the wrapper to keep the reference check exact.
    noise = jax.random.normal(k_noise, (BATCH, NUM_FRAMES, FEATURES_LEN), jnp.float32)

    out = noise_encoder_gru(noise, w_ih, w_hh, b_ih, b_hh)
    out = jax.block_until_ready(out)

    ref = gru_reference(noise, w_ih, w_hh, b_ih, b_hh)
    assert out.shape == (BATCH, NUM_FRAMES, HIDDEN)
    assert jnp.allclose(out, ref, atol=1e-5, rtol=1e-5), "Pallas GRU mismatch vs reference"

    print("KERNEL_OK")
</pallas_src>

<mosaic_0001>
module attributes {stable_mosaic.version = 11 : i64} {
  func.func @gru_kernel(%arg0: i32, %arg1: memref<2x8x10xf32, #tpu.memory_space<vmem>>, %arg2: memref<10x96xf32, #tpu.memory_space<vmem>>, %arg3: memref<32x32xf32, #tpu.memory_space<vmem>>, %arg4: memref<32x32xf32, #tpu.memory_space<vmem>>, %arg5: memref<32x32xf32, #tpu.memory_space<vmem>>, %arg6: memref<1x96xf32, #tpu.memory_space<vmem>>, %arg7: memref<1x32xf32, #tpu.memory_space<vmem>>, %arg8: memref<2x256xf32, #tpu.memory_space<vmem>>) attributes {dimension_semantics = [#tpu.dimension_semantics<arbitrary>], iteration_bounds = array<i64: 1>, scalar_prefetch = 0 : i64, scratch_operands = 0 : i64, tpu.core_type = #tpu.core_type<tc>, window_params = [{pipeline_mode = #tpu.pipeline_mode<synchronous>, transform_indices = @transform_0, window_bounds = array<i64: 2, 8, 10>}, {pipeline_mode = #tpu.pipeline_mode<synchronous>, transform_indices = @transform_1, window_bounds = array<i64: 10, 96>}, {pipeline_mode = #tpu.pipeline_mode<synchronous>, transform_indices = @transform_2, window_bounds = array<i64: 32, 32>}, {pipeline_mode = #tpu.pipeline_mode<synchronous>, transform_indices = @transform_3, window_bounds = array<i64: 32, 32>}, {pipeline_mode = #tpu.pipeline_mode<synchronous>, transform_indices = @transform_4, window_bounds = array<i64: 32, 32>}, {pipeline_mode = #tpu.pipeline_mode<synchronous>, transform_indices = @transform_5, window_bounds = array<i64: 1, 96>}, {pipeline_mode = #tpu.pipeline_mode<synchronous>, transform_indices = @transform_6, window_bounds = array<i64: 1, 32>}, {pipeline_mode = #tpu.pipeline_mode<synchronous>, transform_indices = @transform_7, window_bounds = array<i64: 2, 256>}]} {
    %c0 = arith.constant 0 : index
    %c0_0 = arith.constant 0 : index
    %c0_1 = arith.constant 0 : index
    %0 = vector.load %arg1[%c0, %c0_0, %c0_1] : memref<2x8x10xf32, #tpu.memory_space<vmem>>, vector<2x8x10xf32>
    %1 = vector.shape_cast %0 : vector<2x8x10xf32> to vector<16x10xf32>
    %c0_2 = arith.constant 0 : index
    %c0_3 = arith.constant 0 : index
    %2 = vector.load %arg2[%c0_2, %c0_3] : memref<10x96xf32, #tpu.memory_space<vmem>>, vector<10x96xf32>
    %cst = arith.constant dense<0.000000e+00> : vector<16x96xf32>
    %3 = tpu.matmul %1, %2, %cst {dimension_numbers = #tpu.dot_dimension_numbers<[1], [0], [0], [1], [0, 0, 1, 1], [], []>} : vector<16x10xf32>, vector<10x96xf32>, vector<16x96xf32> -> vector<16x96xf32>
    %c0_4 = arith.constant 0 : index
    %c0_5 = arith.constant 0 : index
    %4 = vector.load %arg6[%c0_4, %c0_5] : memref<1x96xf32, #tpu.memory_space<vmem>>, vector<1x96xf32>
    %5 = vector.broadcast %4 : vector<1x96xf32> to vector<16x96xf32>
    %6 = arith.addf %3, %5 : vector<16x96xf32>
    %7 = vector.shape_cast %6 : vector<16x96xf32> to vector<2x8x96xf32>
    %8 = vector.extract_strided_slice %7 {offsets = [0, 0, 0], sizes = [2, 8, 32], strides = [1, 1, 1]} : vector<2x8x96xf32> to vector<2x8x32xf32>
    %9 = vector.extract_strided_slice %7 {offsets = [0, 0, 32], sizes = [2, 8, 32], strides = [1, 1, 1]} : vector<2x8x96xf32> to vector<2x8x32xf32>
    %10 = vector.extract_strided_slice %7 {offsets = [0, 0, 64], sizes = [2, 8, 32], strides = [1, 1, 1]} : vector<2x8x96xf32> to vector<2x8x32xf32>
    %c0_6 = arith.constant 0 : index
    %c0_7 = arith.constant 0 : index
    %11 = vector.load %arg3[%c0_6, %c0_7] : memref<32x32xf32, #tpu.memory_space<vmem>>, vector<32x32xf32>
    %c0_8 = arith.constant 0 : index
    %c0_9 = arith.constant 0 : index
    %12 = vector.load %arg4[%c0_8, %c0_9] : memref<32x32xf32, #tpu.memory_space<vmem>>, vector<32x32xf32>
    %c0_10 = arith.constant 0 : index
    %c0_11 = arith.constant 0 : index
    %13 = vector.load %arg5[%c0_10, %c0_11] : memref<32x32xf32, #tpu.memory_space<vmem>>, vector<32x32xf32>
    %c0_12 = arith.constant 0 : index
    %c0_13 = arith.constant 0 : index
    %14 = vector.load %arg7[%c0_12, %c0_13] : memref<1x32xf32, #tpu.memory_space<vmem>>, vector<1x32xf32>
    %cst_14 = arith.constant 0.000000e+00 : f32
    %15 = vector.broadcast %cst_14 : f32 to vector<2x32xf32>
    %cst_15 = arith.constant dense<0.000000e+00> : vector<2x32xf32>
    %16 = tpu.matmul %15, %11, %cst_15 {dimension_numbers = #tpu.dot_dimension_numbers<[1], [0], [0], [1], [0, 0, 1, 1], [], []>} : vector<2x32xf32>, vector<32x32xf32>, vector<2x32xf32> -> vector<2x32xf32>
    %cst_16 = arith.constant dense<0.000000e+00> : vector<2x32xf32>
    %17 = tpu.matmul %15, %12, %cst_16 {dimension_numbers = #tpu.dot_dimension_numbers<[1], [0], [0], [1], [0, 0, 1, 1], [], []>} : vector<2x32xf32>, vector<32x32xf32>, vector<2x32xf32> -> vector<2x32xf32>
    %cst_17 = arith.constant dense<0.000000e+00> : vector<2x32xf32>
    %18 = tpu.matmul %15, %13, %cst_17 {dimension_numbers = #tpu.dot_dimension_numbers<[1], [0], [0], [1], [0, 0, 1, 1], [], []>} : vector<2x32xf32>, vector<32x32xf32>, vector<2x32xf32> -> vector<2x32xf32>
    %19 = vector.broadcast %14 : vector<1x32xf32> to vector<2x32xf32>
    %20 = arith.addf %18, %19 : vector<2x32xf32>
    %21 = vector.extract_strided_slice %8 {offsets = [0, 0, 0], sizes = [2, 1, 32], strides = [1, 1, 1]} : vector<2x8x32xf32> to vector<2x1x32xf32>
    %22 = vector.shape_cast %21 : vector<2x1x32xf32> to vector<2x32xf32>
    %23 = arith.addf %22, %16 : vector<2x32xf32>
    %24 = arith.negf %23 : vector<2x32xf32>
    %25 = math.exp %24 : vector<2x32xf32>
    %cst_18 = arith.constant 1.000000e+00 : f32
    %26 = vector.broadcast %cst_18 : f32 to vector<2x32xf32>
    %27 = arith.addf %26, %25 : vector<2x32xf32>
    %28 = arith.divf %26, %27 : vector<2x32xf32>
    %29 = vector.extract_strided_slice %9 {offsets = [0, 0, 0], sizes = [2, 1, 32], strides = [1, 1, 1]} : vector<2x8x32xf32> to vector<2x1x32xf32>
    %30 = vector.shape_cast %29 : vector<2x1x32xf32> to vector<2x32xf32>
    %31 = arith.addf %30, %17 : vector<2x32xf32>
    %32 = arith.negf %31 : vector<2x32xf32>
    %33 = math.exp %32 : vector<2x32xf32>
    %cst_19 = arith.constant 1.000000e+00 : f32
    %34 = vector.broadcast %cst_19 : f32 to vector<2x32xf32>
    %35 = arith.addf %34, %33 : vector<2x32xf32>
    %36 = arith.divf %34, %35 : vector<2x32xf32>
    %37 = vector.extract_strided_slice %10 {offsets = [0, 0, 0], sizes = [2, 1, 32], strides = [1, 1, 1]} : vector<2x8x32xf32> to vector<2x1x32xf32>
    %38 = vector.shape_cast %37 : vector<2x1x32xf32> to vector<2x32xf32>
    %39 = arith.mulf %28, %20 : vector<2x32xf32>
    %40 = arith.addf %38, %39 : vector<2x32xf32>
    %41 = math.tanh %40 : vector<2x32xf32>
    %cst_20 = arith.constant 1.000000e+00 : f32
    %42 = vector.broadcast %cst_20 : f32 to vector<2x32xf32>
    %43 = arith.subf %42, %36 : vector<2x32xf32>
    %44 = arith.mulf %43, %41 : vector<2x32xf32>
    %45 = arith.mulf %36, %15 : vector<2x32xf32>
    %46 = arith.addf %44, %45 : vector<2x32xf32>
    %cst_21 = arith.constant dense<0.000000e+00> : vector<2x32xf32>
    %47 = tpu.matmul %46, %11, %cst_21 {dimension_numbers = #tpu.dot_dimension_numbers<[1], [0], [0], [1], [0, 0, 1, 1], [], []>} : vector<2x32xf32>, vector<32x32xf32>, vector<2x32xf32> -> vector<2x32xf32>
    %cst_22 = arith.constant dense<0.000000e+00> : vector<2x32xf32>
    %48 = tpu.matmul %46, %12, %cst_22 {dimension_numbers = #tpu.dot_dimension_numbers<[1], [0], [0], [1], [0, 0, 1, 1], [], []>} : vector<2x32xf32>, vector<32x32xf32>, vector<2x32xf32> -> vector<2x32xf32>
    %cst_23 = arith.constant dense<0.000000e+00> : vector<2x32xf32>
    %49 = tpu.matmul %46, %13, %cst_23 {dimension_numbers = #tpu.dot_dimension_numbers<[1], [0], [0], [1], [0, 0, 1, 1], [], []>} : vector<2x32xf32>, vector<32x32xf32>, vector<2x32xf32> -> vector<2x32xf32>
    %50 = vector.broadcast %14 : vector<1x32xf32> to vector<2x32xf32>
    %51 = arith.addf %49, %50 : vector<2x32xf32>
    %52 = vector.extract_strided_slice %8 {offsets = [0, 1, 0], sizes = [2, 1, 32], strides = [1, 1, 1]} : vector<2x8x32xf32> to vector<2x1x32xf32>
    %53 = vector.shape_cast %52 : vector<2x1x32xf32> to vector<2x32xf32>
    %54 = arith.addf %53, %47 : vector<2x32xf32>
    %55 = arith.negf %54 : vector<2x32xf32>
    %56 = math.exp %55 : vector<2x32xf32>
    %cst_24 = arith.constant 1.000000e+00 : f32
    %57 = vector.broadcast %cst_24 : f32 to vector<2x32xf32>
    %58 = arith.addf %57, %56 : vector<2x32xf32>
    %59 = arith.divf %57, %58 : vector<2x32xf32>
    %60 = vector.extract_strided_slice %9 {offsets = [0, 1, 0], sizes = [2, 1, 32], strides = [1, 1, 1]} : vector<2x8x32xf32> to vector<2x1x32xf32>
    %61 = vector.shape_cast %60 : vector<2x1x32xf32> to vector<2x32xf32>
    %62 = arith.addf %61, %48 : vector<2x32xf32>
    %63 = arith.negf %62 : vector<2x32xf32>
    %64 = math.exp %63 : vector<2x32xf32>
    %cst_25 = arith.constant 1.000000e+00 : f32
    %65 = vector.broadcast %cst_25 : f32 to vector<2x32xf32>
    %66 = arith.addf %65, %64 : vector<2x32xf32>
    %67 = arith.divf %65, %66 : vector<2x32xf32>
    %68 = vector.extract_strided_slice %10 {offsets = [0, 1, 0], sizes = [2, 1, 32], strides = [1, 1, 1]} : vector<2x8x32xf32> to vector<2x1x32xf32>
    %69 = vector.shape_cast %68 : vector<2x1x32xf32> to vector<2x32xf32>
    %70 = arith.mulf %59, %51 : vector<2x32xf32>
    %71 = arith.addf %69, %70 : vector<2x32xf32>
    %72 = math.tanh %71 : vector<2x32xf32>
    %cst_26 = arith.constant 1.000000e+00 : f32
    %73 = vector.broadcast %cst_26 : f32 to vector<2x32xf32>
    %74 = arith.subf %73, %67 : vector<2x32xf32>
    %75 = arith.mulf %74, %72 : vector<2x32xf32>
    %76 = arith.mulf %67, %46 : vector<2x32xf32>
    %77 = arith.addf %75, %76 : vector<2x32xf32>
    %cst_27 = arith.constant dense<0.000000e+00> : vector<2x32xf32>
    %78 = tpu.matmul %77, %11, %cst_27 {dimension_numbers = #tpu.dot_dimension_numbers<[1], [0], [0], [1], [0, 0, 1, 1], [], []>} : vector<2x32xf32>, vector<32x32xf32>, vector<2x32xf32> -> vector<2x32xf32>
    %cst_28 = arith.constant dense<0.000000e+00> : vector<2x32xf32>
    %79 = tpu.matmul %77, %12, %cst_28 {dimension_numbers = #tpu.dot_dimension_numbers<[1], [0], [0], [1], [0, 0, 1, 1], [], []>} : vector<2x32xf32>, vector<32x32xf32>, vector<2x32xf32> -> vector<2x32xf32>
    %cst_29 = arith.constant dense<0.000000e+00> : vector<2x32xf32>
    %80 = tpu.matmul %77, %13, %cst_29 {dimension_numbers = #tpu.dot_dimension_numbers<[1], [0], [0], [1], [0, 0, 1, 1], [], []>} : vector<2x32xf32>, vector<32x32xf32>, vector<2x32xf32> -> vector<2x32xf32>
    %81 = vector.broadcast %14 : vector<1x32xf32> to vector<2x32xf32>
    %82 = arith.addf %80, %81 : vector<2x32xf32>
    %83 = vector.extract_strided_slice %8 {offsets = [0, 2, 0], sizes = [2, 1, 32], strides = [1, 1, 1]} : vector<2x8x32xf32> to vector<2x1x32xf32>
    %84 = vector.shape_cast %83 : vector<2x1x32xf32> to vector<2x32xf32>
    %85 = arith.addf %84, %78 : vector<2x32xf32>
    %86 = arith.negf %85 : vector<2x32xf32>
    %87 = math.exp %86 : vector<2x32xf32>
    %cst_30 = arith.constant 1.000000e+00 : f32
    %88 = vector.broadcast %cst_30 : f32 to vector<2x32xf32>
    %89 = arith.addf %88, %87 : vector<2x32xf32>
    %90 = arith.divf %88, %89 : vector<2x32xf32>
    %91 = vector.extract_strided_slice %9 {offsets = [0, 2, 0], sizes = [2, 1, 32], strides = [1, 1, 1]} : vector<2x8x32xf32> to vector<2x1x32xf32>
    %92 = vector.shape_cast %91 : vector<2x1x32xf32> to vector<2x32xf32>
    %93 = arith.addf %92, %79 : vector<2x32xf32>
    %94 = arith.negf %93 : vector<2x32xf32>
    %95 = math.exp %94 : vector<2x32xf32>
    %cst_31 = arith.constant 1.000000e+00 : f32
    %96 = vector.broadcast %cst_31 : f32 to vector<2x32xf32>
    %97 = arith.addf %96, %95 : vector<2x32xf32>
    %98 = arith.divf %96, %97 : vector<2x32xf32>
    %99 = vector.extract_strided_slice %10 {offsets = [0, 2, 0], sizes = [2, 1, 32], strides = [1, 1, 1]} : vector<2x8x32xf32> to vector<2x1x32xf32>
    %100 = vector.shape_cast %99 : vector<2x1x32xf32> to vector<2x32xf32>
    %101 = arith.mulf %90, %82 : vector<2x32xf32>
    %102 = arith.addf %100, %101 : vector<2x32xf32>
    %103 = math.tanh %102 : vector<2x32xf32>
    %cst_32 = arith.constant 1.000000e+00 : f32
    %104 = vector.broadcast %cst_32 : f32 to vector<2x32xf32>
    %105 = arith.subf %104, %98 : vector<2x32xf32>
    %106 = arith.mulf %105, %103 : vector<2x32xf32>
    %107 = arith.mulf %98, %77 : vector<2x32xf32>
    %108 = arith.addf %106, %107 : vector<2x32xf32>
    %cst_33 = arith.constant dense<0.000000e+00> : vector<2x32xf32>
    %109 = tpu.matmul %108, %11, %cst_33 {dimension_numbers = #tpu.dot_dimension_numbers<[1], [0], [0], [1], [0, 0, 1, 1], [], []>} : vector<2x32xf32>, vector<32x32xf32>, vector<2x32xf32> -> vector<2x32xf32>
    %cst_34 = arith.constant dense<0.000000e+00> : vector<2x32xf32>
    %110 = tpu.matmul %108, %12, %cst_34 {dimension_numbers = #tpu.dot_dimension_numbers<[1], [0], [0], [1], [0, 0, 1, 1], [], []>} : vector<2x32xf32>, vector<32x32xf32>, vector<2x32xf32> -> vector<2x32xf32>
    %cst_35 = arith.constant dense<0.000000e+00> : vector<2x32xf32>
    %111 = tpu.matmul %108, %13, %cst_35 {dimension_numbers = #tpu.dot_dimension_numbers<[1], [0], [0], [1], [0, 0, 1, 1], [], []>} : vector<2x32xf32>, vector<32x32xf32>, vector<2x32xf32> -> vector<2x32xf32>
    %112 = vector.broadcast %14 : vector<1x32xf32> to vector<2x32xf32>
    %113 = arith.addf %111, %112 : vector<2x32xf32>
    %114 = vector.extract_strided_slice %8 {offsets = [0, 3, 0], sizes = [2, 1, 32], strides = [1, 1, 1]} : vector<2x8x32xf32> to vector<2x1x32xf32>
    %115 = vector.shape_cast %114 : vector<2x1x32xf32> to vector<2x32xf32>
    %116 = arith.addf %115, %109 : vector<2x32xf32>
    %117 = arith.negf %116 : vector<2x32xf32>
    %118 = math.exp %117 : vector<2x32xf32>
    %cst_36 = arith.constant 1.000000e+00 : f32
    %119 = vector.broadcast %cst_36 : f32 to vector<2x32xf32>
    %120 = arith.addf %119, %118 : vector<2x32xf32>
    %121 = arith.divf %119, %120 : vector<2x32xf32>
    %122 = vector.extract_strided_slice %9 {offsets = [0, 3, 0], sizes = [2, 1, 32], strides = [1, 1, 1]} : vector<2x8x32xf32> to vector<2x1x32xf32>
    %123 = vector.shape_cast %122 : vector<2x1x32xf32> to vector<2x32xf32>
    %124 = arith.addf %123, %110 : vector<2x32xf32>
    %125 = arith.negf %124 : vector<2x32xf32>
    %126 = math.exp %125 : vector<2x32xf32>
    %cst_37 = arith.constant 1.000000e+00 : f32
    %127 = vector.broadcast %cst_37 : f32 to vector<2x32xf32>
    %128 = arith.addf %127, %126 : vector<2x32xf32>
    %129 = arith.divf %127, %128 : vector<2x32xf32>
    %130 = vector.extract_strided_slice %10 {offsets = [0, 3, 0], sizes = [2, 1, 32], strides = [1, 1, 1]} : vector<2x8x32xf32> to vector<2x1x32xf32>
    %131 = vector.shape_cast %130 : vector<2x1x32xf32> to vector<2x32xf32>
    %132 = arith.mulf %121, %113 : vector<2x32xf32>
    %133 = arith.addf %131, %132 : vector<2x32xf32>
    %134 = math.tanh %133 : vector<2x32xf32>
    %cst_38 = arith.constant 1.000000e+00 : f32
    %135 = vector.broadcast %cst_38 : f32 to vector<2x32xf32>
    %136 = arith.subf %135, %129 : vector<2x32xf32>
    %137 = arith.mulf %136, %134 : vector<2x32xf32>
    %138 = arith.mulf %129, %108 : vector<2x32xf32>
    %139 = arith.addf %137, %138 : vector<2x32xf32>
    %cst_39 = arith.constant dense<0.000000e+00> : vector<2x32xf32>
    %140 = tpu.matmul %139, %11, %cst_39 {dimension_numbers = #tpu.dot_dimension_numbers<[1], [0], [0], [1], [0, 0, 1, 1], [], []>} : vector<2x32xf32>, vector<32x32xf32>, vector<2x32xf32> -> vector<2x32xf32>
    %cst_40 = arith.constant dense<0.000000e+00> : vector<2x32xf32>
    %141 = tpu.matmul %139, %12, %cst_40 {dimension_numbers = #tpu.dot_dimension_numbers<[1], [0], [0], [1], [0, 0, 1, 1], [], []>} : vector<2x32xf32>, vector<32x32xf32>, vector<2x32xf32> -> vector<2x32xf32>
    %cst_41 = arith.constant dense<0.000000e+00> : vector<2x32xf32>
    %142 = tpu.matmul %139, %13, %cst_41 {dimension_numbers = #tpu.dot_dimension_numbers<[1], [0], [0], [1], [0, 0, 1, 1], [], []>} : vector<2x32xf32>, vector<32x32xf32>, vector<2x32xf32> -> vector<2x32xf32>
    %143 = vector.broadcast %14 : vector<1x32xf32> to vector<2x32xf32>
    %144 = arith.addf %142, %143 : vector<2x32xf32>
    %145 = vector.extract_strided_slice %8 {offsets = [0, 4, 0], sizes = [2, 1, 32], strides = [1, 1, 1]} : vector<2x8x32xf32> to vector<2x1x32xf32>
    %146 = vector.shape_cast %145 : vector<2x1x32xf32> to vector<2x32xf32>
    %147 = arith.addf %146, %140 : vector<2x32xf32>
    %148 = arith.negf %147 : vector<2x32xf32>
    %149 = math.exp %148 : vector<2x32xf32>
    %cst_42 = arith.constant 1.000000e+00 : f32
    %150 = vector.broadcast %cst_42 : f32 to vector<2x32xf32>
    %151 = arith.addf %150, %149 : vector<2x32xf32>
    %152 = arith.divf %150, %151 : vector<2x32xf32>
    %153 = vector.extract_strided_slice %9 {offsets = [0, 4, 0], sizes = [2, 1, 32], strides = [1, 1, 1]} : vector<2x8x32xf32> to vector<2x1x32xf32>
    %154 = vector.shape_cast %153 : vector<2x1x32xf32> to vector<2x32xf32>
    %155 = arith.addf %154, %141 : vector<2x32xf32>
    %156 = arith.negf %155 : vector<2x32xf32>
    %157 = math.exp %156 : vector<2x32xf32>
    %cst_43 = arith.constant 1.000000e+00 : f32
    %158 = vector.broadcast %cst_43 : f32 to vector<2x32xf32>
    %159 = arith.addf %158, %157 : vector<2x32xf32>
    %160 = arith.divf %158, %159 : vector<2x32xf32>
    %161 = vector.extract_strided_slice %10 {offsets = [0, 4, 0], sizes = [2, 1, 32], strides = [1, 1, 1]} : vector<2x8x32xf32> to vector<2x1x32xf32>
    %162 = vector.shape_cast %161 : vector<2x1x32xf32> to vector<2x32xf32>
    %163 = arith.mulf %152, %144 : vector<2x32xf32>
    %164 = arith.addf %162, %163 : vector<2x32xf32>
    %165 = math.tanh %164 : vector<2x32xf32>
    %cst_44 = arith.constant 1.000000e+00 : f32
    %166 = vector.broadcast %cst_44 : f32 to vector<2x32xf32>
    %167 = arith.subf %166, %160 : vector<2x32xf32>
    %168 = arith.mulf %167, %165 : vector<2x32xf32>
    %169 = arith.mulf %160, %139 : vector<2x32xf32>
    %170 = arith.addf %168, %169 : vector<2x32xf32>
    %cst_45 = arith.constant dense<0.000000e+00> : vector<2x32xf32>
    %171 = tpu.matmul %170, %11, %cst_45 {dimension_numbers = #tpu.dot_dimension_numbers<[1], [0], [0], [1], [0, 0, 1, 1], [], []>} : vector<2x32xf32>, vector<32x32xf32>, vector<2x32xf32> -> vector<2x32xf32>
    %cst_46 = arith.constant dense<0.000000e+00> : vector<2x32xf32>
    %172 = tpu.matmul %170, %12, %cst_46 {dimension_numbers = #tpu.dot_dimension_numbers<[1], [0], [0], [1], [0, 0, 1, 1], [], []>} : vector<2x32xf32>, vector<32x32xf32>, vector<2x32xf32> -> vector<2x32xf32>
    %cst_47 = arith.constant dense<0.000000e+00> : vector<2x32xf32>
    %173 = tpu.matmul %170, %13, %cst_47 {dimension_numbers = #tpu.dot_dimension_numbers<[1], [0], [0], [1], [0, 0, 1, 1], [], []>} : vector<2x32xf32>, vector<32x32xf32>, vector<2x32xf32> -> vector<2x32xf32>
    %174 = vector.broadcast %14 : vector<1x32xf32> to vector<2x32xf32>
    %175 = arith.addf %173, %174 : vector<2x32xf32>
    %176 = vector.extract_strided_slice %8 {offsets = [0, 5, 0], sizes = [2, 1, 32], strides = [1, 1, 1]} : vector<2x8x32xf32> to vector<2x1x32xf32>
    %177 = vector.shape_cast %176 : vector<2x1x32xf32> to vector<2x32xf32>
    %178 = arith.addf %177, %171 : vector<2x32xf32>
    %179 = arith.negf %178 : vector<2x32xf32>
    %180 = math.exp %179 : vector<2x32xf32>
    %cst_48 = arith.constant 1.000000e+00 : f32
    %181 = vector.broadcast %cst_48 : f32 to vector<2x32xf32>
    %182 = arith.addf %181, %180 : vector<2x32xf32>
    %183 = arith.divf %181, %182 : vector<2x32xf32>
    %184 = vector.extract_strided_slice %9 {offsets = [0, 5, 0], sizes = [2, 1, 32], strides = [1, 1, 1]} : vector<2x8x32xf32> to vector<2x1x32xf32>
    %185 = vector.shape_cast %184 : vector<2x1x32xf32> to vector<2x32xf32>
    %186 = arith.addf %185, %172 : vector<2x32xf32>
    %187 = arith.negf %186 : vector<2x32xf32>
    %188 = math.exp %187 : vector<2x32xf32>
    %cst_49 = arith.constant 1.000000e+00 : f32
    %189 = vector.broadcast %cst_49 : f32 to vector<2x32xf32>
    %190 = arith.addf %189, %188 : vector<2x32xf32>
    %191 = arith.divf %189, %190 : vector<2x32xf32>
    %192 = vector.extract_strided_slice %10 {offsets = [0, 5, 0], sizes = [2, 1, 32], strides = [1, 1, 1]} : vector<2x8x32xf32> to vector<2x1x32xf32>
    %193 = vector.shape_cast %192 : vector<2x1x32xf32> to vector<2x32xf32>
    %194 = arith.mulf %183, %175 : vector<2x32xf32>
    %195 = arith.addf %193, %194 : vector<2x32xf32>
    %196 = math.tanh %195 : vector<2x32xf32>
    %cst_50 = arith.constant 1.000000e+00 : f32
    %197 = vector.broadcast %cst_50 : f32 to vector<2x32xf32>
    %198 = arith.subf %197, %191 : vector<2x32xf32>
    %199 = arith.mulf %198, %196 : vector<2x32xf32>
    %200 = arith.mulf %191, %170 : vector<2x32xf32>
    %201 = arith.addf %199, %200 : vector<2x32xf32>
    %cst_51 = arith.constant dense<0.000000e+00> : vector<2x32xf32>
    %202 = tpu.matmul %201, %11, %cst_51 {dimension_numbers = #tpu.dot_dimension_numbers<[1], [0], [0], [1], [0, 0, 1, 1], [], []>} : vector<2x32xf32>, vector<32x32xf32>, vector<2x32xf32> -> vector<2x32xf32>
    %cst_52 = arith.constant dense<0.000000e+00> : vector<2x32xf32>
    %203 = tpu.matmul %201, %12, %cst_52 {dimension_numbers = #tpu.dot_dimension_numbers<[1], [0], [0], [1], [0, 0, 1, 1], [], []>} : vector<2x32xf32>, vector<32x32xf32>, vector<2x32xf32> -> vector<2x32xf32>
    %cst_53 = arith.constant dense<0.000000e+00> : vector<2x32xf32>
    %204 = tpu.matmul %201, %13, %cst_53 {dimension_numbers = #tpu.dot_dimension_numbers<[1], [0], [0], [1], [0, 0, 1, 1], [], []>} : vector<2x32xf32>, vector<32x32xf32>, vector<2x32xf32> -> vector<2x32xf32>
    %205 = vector.broadcast %14 : vector<1x32xf32> to vector<2x32xf32>
    %206 = arith.addf %204, %205 : vector<2x32xf32>
    %207 = vector.extract_strided_slice %8 {offsets = [0, 6, 0], sizes = [2, 1, 32], strides = [1, 1, 1]} : vector<2x8x32xf32> to vector<2x1x32xf32>
    %208 = vector.shape_cast %207 : vector<2x1x32xf32> to vector<2x32xf32>
    %209 = arith.addf %208, %202 : vector<2x32xf32>
    %210 = arith.negf %209 : vector<2x32xf32>
    %211 = math.exp %210 : vector<2x32xf32>
    %cst_54 = arith.constant 1.000000e+00 : f32
    %212 = vector.broadcast %cst_54 : f32 to vector<2x32xf32>
    %213 = arith.addf %212, %211 : vector<2x32xf32>
    %214 = arith.divf %212, %213 : vector<2x32xf32>
    %215 = vector.extract_strided_slice %9 {offsets = [0, 6, 0], sizes = [2, 1, 32], strides = [1, 1, 1]} : vector<2x8x32xf32> to vector<2x1x32xf32>
    %216 = vector.shape_cast %215 : vector<2x1x32xf32> to vector<2x32xf32>
    %217 = arith.addf %216, %203 : vector<2x32xf32>
    %218 = arith.negf %217 : vector<2x32xf32>
    %219 = math.exp %218 : vector<2x32xf32>
    %cst_55 = arith.constant 1.000000e+00 : f32
    %220 = vector.broadcast %cst_55 : f32 to vector<2x32xf32>
    %221 = arith.addf %220, %219 : vector<2x32xf32>
    %222 = arith.divf %220, %221 : vector<2x32xf32>
    %223 = vector.extract_strided_slice %10 {offsets = [0, 6, 0], sizes = [2, 1, 32], strides = [1, 1, 1]} : vector<2x8x32xf32> to vector<2x1x32xf32>
    %224 = vector.shape_cast %223 : vector<2x1x32xf32> to vector<2x32xf32>
    %225 = arith.mulf %214, %206 : vector<2x32xf32>
    %226 = arith.addf %224, %225 : vector<2x32xf32>
    %227 = math.tanh %226 : vector<2x32xf32>
    %cst_56 = arith.constant 1.000000e+00 : f32
    %228 = vector.broadcast %cst_56 : f32 to vector<2x32xf32>
    %229 = arith.subf %228, %222 : vector<2x32xf32>
    %230 = arith.mulf %229, %227 : vector<2x32xf32>
    %231 = arith.mulf %222, %201 : vector<2x32xf32>
    %232 = arith.addf %230, %231 : vector<2x32xf32>
    %cst_57 = arith.constant dense<0.000000e+00> : vector<2x32xf32>
    %233 = tpu.matmul %232, %11, %cst_57 {dimension_numbers = #tpu.dot_dimension_numbers<[1], [0], [0], [1], [0, 0, 1, 1], [], []>} : vector<2x32xf32>, vector<32x32xf32>, vector<2x32xf32> -> vector<2x32xf32>
    %cst_58 = arith.constant dense<0.000000e+00> : vector<2x32xf32>
    %234 = tpu.matmul %232, %12, %cst_58 {dimension_numbers = #tpu.dot_dimension_numbers<[1], [0], [0], [1], [0, 0, 1, 1], [], []>} : vector<2x32xf32>, vector<32x32xf32>, vector<2x32xf32> -> vector<2x32xf32>
    %cst_59 = arith.constant dense<0.000000e+00> : vector<2x32xf32>
    %235 = tpu.matmul %232, %13, %cst_59 {dimension_numbers = #tpu.dot_dimension_numbers<[1], [0], [0], [1], [0, 0, 1, 1], [], []>} : vector<2x32xf32>, vector<32x32xf32>, vector<2x32xf32> -> vector<2x32xf32>
    %236 = vector.broadcast %14 : vector<1x32xf32> to vector<2x32xf32>
    %237 = arith.addf %235, %236 : vector<2x32xf32>
    %238 = vector.extract_strided_slice %8 {offsets = [0, 7, 0], sizes = [2, 1, 32], strides = [1, 1, 1]} : vector<2x8x32xf32> to vector<2x1x32xf32>
    %239 = vector.shape_cast %238 : vector<2x1x32xf32> to vector<2x32xf32>
    %240 = arith.addf %239, %233 : vector<2x32xf32>
    %241 = arith.negf %240 : vector<2x32xf32>
    %242 = math.exp %241 : vector<2x32xf32>
    %cst_60 = arith.constant 1.000000e+00 : f32
    %243 = vector.broadcast %cst_60 : f32 to vector<2x32xf32>
    %244 = arith.addf %243, %242 : vector<2x32xf32>
    %245 = arith.divf %243, %244 : vector<2x32xf32>
    %246 = vector.extract_strided_slice %9 {offsets = [0, 7, 0], sizes = [2, 1, 32], strides = [1, 1, 1]} : vector<2x8x32xf32> to vector<2x1x32xf32>
    %247 = vector.shape_cast %246 : vector<2x1x32xf32> to vector<2x32xf32>
    %248 = arith.addf %247, %234 : vector<2x32xf32>
    %249 = arith.negf %248 : vector<2x32xf32>
    %250 = math.exp %249 : vector<2x32xf32>
    %cst_61 = arith.constant 1.000000e+00 : f32
    %251 = vector.broadcast %cst_61 : f32 to vector<2x32xf32>
    %252 = arith.addf %251, %250 : vector<2x32xf32>
    %253 = arith.divf %251, %252 : vector<2x32xf32>
    %254 = vector.extract_strided_slice %10 {offsets = [0, 7, 0], sizes = [2, 1, 32], strides = [1, 1, 1]} : vector<2x8x32xf32> to vector<2x1x32xf32>
    %255 = vector.shape_cast %254 : vector<2x1x32xf32> to vector<2x32xf32>
    %256 = arith.mulf %245, %237 : vector<2x32xf32>
    %257 = arith.addf %255, %256 : vector<2x32xf32>
    %258 = math.tanh %257 : vector<2x32xf32>
    %cst_62 = arith.constant 1.000000e+00 : f32
    %259 = vector.broadcast %cst_62 : f32 to vector<2x32xf32>
    %260 = arith.subf %259, %253 : vector<2x32xf32>
    %261 = arith.mulf %260, %258 : vector<2x32xf32>
    %262 = arith.mulf %253, %232 : vector<2x32xf32>
    %263 = arith.addf %261, %262 : vector<2x32xf32>
    %264 = tpu.concatenate %46, %77, %108, %139, %170, %201, %232, %263 in 1 : vector<2x32xf32>, vector<2x32xf32>, vector<2x32xf32>, vector<2x32xf32>, vector<2x32xf32>, vector<2x32xf32>, vector<2x32xf32>, vector<2x32xf32> -> vector<2x256xf32>
    %c0_63 = arith.constant 0 : index
    %c0_64 = arith.constant 0 : index
    %265 = vector.load %arg8[%c0_63, %c0_64] : memref<2x256xf32, #tpu.memory_space<vmem>>, vector<2x256xf32>
    tpu.vector_store %arg8[%c0_63, %c0_64], %264 {strides = array<i32>} : memref<2x256xf32, #tpu.memory_space<vmem>>, vector<2x256xf32>,
    return
  }
  func.func @transform_0(%arg0: i32) -> (i32, i32, i32) {
    %c0_i32 = arith.constant 0 : i32
    %c0_i32_0 = arith.constant 0 : i32
    %c0_i32_1 = arith.constant 0 : i32
    %c0_i32_2 = arith.constant 0 : i32
    return %c0_i32, %c0_i32_0, %c0_i32_1 : i32, i32, i32
  }
  func.func @transform_1(%arg0: i32) -> (i32, i32) {
    %c0_i32 = arith.constant 0 : i32
    %c0_i32_0 = arith.constant 0 : i32
    %c0_i32_1 = arith.constant 0 : i32
    return %c0_i32, %c0_i32_0 : i32, i32
  }
  func.func @transform_2(%arg0: i32) -> (i32, i32) {
    %c0_i32 = arith.constant 0 : i32
    %c0_i32_0 = arith.constant 0 : i32
    %c0_i32_1 = arith.constant 0 : i32
    return %c0_i32, %c0_i32_0 : i32, i32
  }
  func.func @transform_3(%arg0: i32) -> (i32, i32) {
    %c0_i32 = arith.constant 0 : i32
    %c0_i32_0 = arith.constant 0 : i32
    %c0_i32_1 = arith.constant 0 : i32
    return %c0_i32, %c0_i32_0 : i32, i32
  }
  func.func @transform_4(%arg0: i32) -> (i32, i32) {
    %c0_i32 = arith.constant 0 : i32
    %c0_i32_0 = arith.constant 0 : i32
    %c0_i32_1 = arith.constant 0 : i32
    return %c0_i32, %c0_i32_0 : i32, i32
  }
  func.func @transform_5(%arg0: i32) -> (i32, i32) {
    %c0_i32 = arith.constant 0 : i32
    %c0_i32_0 = arith.constant 0 : i32
    %c0_i32_1 = arith.constant 0 : i32
    return %c0_i32, %c0_i32_0 : i32, i32
  }
  func.func @transform_6(%arg0: i32) -> (i32, i32) {
    %c0_i32 = arith.constant 0 : i32
    %c0_i32_0 = arith.constant 0 : i32
    %c0_i32_1 = arith.constant 0 : i32
    return %c0_i32, %c0_i32_0 : i32, i32
  }
  func.func @transform_7(%arg0: i32) -> (i32, i32) {
    %c0_i32 = arith.constant 0 : i32
    %c0_i32_0 = arith.constant 0 : i32
    %c0_i32_1 = arith.constant 0 : i32
    return %c0_i32, %c0_i32_0 : i32, i32
  }
}

</mosaic_0001>

<bundles_post_ra>
// kernel: noise_encoder_gru.1
= control target key start
LH: loop header
LB: loop body
LE: loop exit
PB: predicated region body
PF: predicated region fallthrough
CT: control target
= control target key end

     0   :  { %vm44_vm0 = vcmask 1041408   ;;  %vm37_vm1 = vcmask 80896   ;;  %v3342_v0 = vmov 0.0|0.0   ;;  %vm3343_vm2 = vmmov 1   ;;  %s3347_s9 = smov 64   ;;  %s3348_s10 = smov 96   ;;  %s3859_s1 = inlined_call_operand.vmem [shape: f32[10,96], index: 1, kind: input, shape index: {}]   ;;  %s3860_s2 = inlined_call_operand.vmem [shape: f32[32,32], index: 2, kind: input, shape index: {}]   ;;  %s3861_s0 = inlined_call_operand.vmem [shape: f32[2,8,10], index: 0, kind: input, shape index: {}]   ;;  %s3862_s3 = inlined_call_operand.vmem [shape: f32[32,32], index: 3, kind: input, shape index: {}]   ;;  %s3863_s4 = inlined_call_operand.vmem [shape: f32[32,32], index: 4, kind: input, shape index: {}]   ;;  %s3864_s5 = inlined_call_operand.vmem [shape: f32[1,96], index: 5, kind: input, shape index: {}]   ;;  %s3865_s6 = inlined_call_operand.vmem [shape: f32[1,32], index: 6, kind: input, shape index: {}]   ;;  %s3866_s7 = inlined_call_operand.vmem [shape: f32[2,256], index: 7, kind: output, shape index: {}]  }
   0x1   :  { %3030 = vmatprep.subr.bf16.mxu1 %v3342_v0  ;;  %v28_v1 = vld [vmem:[%s3859_s1] sm:$0xff]  ;;  %v29_v2 = vld [vmem:[%s3859_s1 + $0x8] sm:$0x3]  ;;  %vm3396_vm3 = vmpackc.low %vm44_vm0, %vm3343_vm2  ;;  %vm3344_vm4 = vmmov 0   ;;  %v3345_v8 = vmov 0.0   ;;  %vm433_vm5 = vcmask 1041409  }
   0x2   :  { %v3024_v4 = vpack.c.bf16 %v29_v2, %v28_v1  ;;  %v123_v5 = vld [vmem:[%s3860_s2] sm:$0xff]  ;;  %v124_v6 = vld [vmem:[%s3860_s2 + $0x8] sm:$0xff]  ;;  %2768 = vmatprep.mubr.msk.f32.mxu1 %vm3344_vm4, %v3345_v8  ;;  %v125_v10 = vld [vmem:[%s3860_s2 + $0x10] sm:$0xff]  ;;  %vm136_vm6 = vcmask 261120   ;;  %vm2547_vm7 = vcmask 523264   ;;  %vm2549_vm8 = vcmask 785408  }
   0x3   :  { %v26_v7 = vld [vmem:[%s3861_s0] sm:$0xff]  ;;  %v3411_v9 = vpack.c.bf16 %v124_v6, %v123_v5  ;;  %v126_v11 = vld [vmem:[%s3860_s2 + $0x18] sm:$0xff]  ;;  %v128_v13 = vld [vmem:[%s3862_s3 + $0x8] sm:$0xff] }
   0x4   :  { %2757 = vmatprep.mubr.msk.f32.mxu0 %vm37_vm1, %v26_v7  ;;  %3026 = vmatprep.subr.msk.bf16.mxu0 %vm3396_vm3, %v3024_v4  ;;  %v127_v12 = vld [vmem:[%s3862_s3] sm:$0xff]  ;;  %v27_v14 = vld [vmem:[%s3861_s0 + $0x8] sm:$0xff]  ;;  %v3434_v15 = vpack.c.bf16 %v126_v11, %v125_v10  ;;  %v129_v17 = vld [vmem:[%s3862_s3 + $0x10] sm:$0xff] }
   0x5   :  { %3032 = vmatpush3.bf16.msra.mxu1 %v3411_v9  ;;  %3029 = vmatpush3.bf16.msk.msra.mxu0 %vm3396_vm3, %v3024_v4  ;;  %v3436_v16 = vpack.c.bf16 %v128_v13, %v127_v12  ;;  %v130_v18 = vld [vmem:[%s3862_s3 + $0x18] sm:$0xff]  ;;  %v131_v19 = vld [vmem:[%s3863_s4] sm:$0xff]  ;;  %v132_v20 = vld [vmem:[%s3863_s4 + $0x8] sm:$0xff] }
   0x6   :  { %3033 = vmatprep.subr.bf16.mxu1 %v3342_v0  ;;  %3036 = vmatprep.subr.bf16.mxu0 %v3342_v0  ;;  %v3455_v21 = vpack.c.bf16 %v130_v18, %v129_v17  ;;  %v3457_v22 = vpack.c.bf16 %v132_v20, %v131_v19  ;;  %v133_v23 = vld [vmem:[%s3863_s4 + $0x10] sm:$0xff]  ;;  %v134_v24 = vld [vmem:[%s3863_s4 + $0x18] sm:$0xff]  ;;  %v2570_v26 = vld [vmem:[%s3864_s5] ss:$0 sm:$0xff]  ;;  %s3346_s5 = smov 32  }
   0x7   :  { %v3472_v25 = vpack.c.bf16 %v134_v24, %v133_v23  ;;  %v3508_v47 = vld [vmem:[%s3865_s6] ss:$0 sm:$0xff] }
   0x8   :  { %2758 = vmatmul.mubr.msk.f32.vlgmr.msra.gmra.mrb[0].mxu0 %vm37_vm1, %v27_v14 }
   0x9   :  { %3035 = vmatpush3.bf16.msra.mxu1 %v3434_v15  ;;  %3038 = vmatpush3.bf16.msra.mxu0 %v3436_v16 }
   0xa   :  { %3039 = vmatprep.subr.bf16.mxu0 %v3342_v0  ;;  %2779 = vmatprep.mubr.msk.f32.mxu0 %vm3344_vm4, %v3345_v8 }
   0xb   :  { %3042 = vmatprep.subr.bf16.mxu1 %v3342_v0 }
   0xc   :  { %2769 = vmatmul.mubr.f32.vlgmr.msra.gmra.mrb[0].mxu1 %v3345_v8 }
   0xd   :  { %3041 = vmatpush3.bf16.msra.mxu0 %v3455_v21  ;;  %3044 = vmatpush3.bf16.msra.mxu1 %v3457_v22 }
   0xe   :  { %3045 = vmatprep.subr.bf16.mxu1 %v3342_v0  ;;  %2790 = vmatprep.mubr.msk.f32.mxu1 %vm3344_vm4, %v3345_v8 }
   0xf   :  { %3048 = vmatprep.subr.bf16.mxu0 %v3342_v0 }
  0x10   :  { %2780 = vmatmul.mubr.f32.vlgmr.msra.gmra.mrb[2].mxu0 %v3345_v8 }
  0x11   :  { %3047 = vmatpush3.bf16.msra.mxu1 %v3472_v25  ;;  %3050 = vmatpush3.bf16.msra.mxu0 %v3411_v9 }
  0x12   :  { %3054 = vmatprep.subr.bf16.mxu1 %v3342_v0  ;;  %3051 = vmatprep.subr.bf16.mxu0 %v3342_v0 }
  0x13   :  { %2801 = vmatprep.mubr.msk.f32.mxu0 %vm3344_vm4, %v3345_v8 }
  0x14   :  { %2791 = vmatmul.mubr.f32.vlgmr.msra.gmra.mrb[2].mxu1 %v3345_v8 }
  0x15   :  { %3056 = vmatpush3.bf16.msra.mxu1 %v3436_v16  ;;  %3053 = vmatpush3.bf16.msra.mxu0 %v3434_v15 }
  0x16   :  { %3057 = vmatprep.subr.bf16.mxu1 %v3342_v0  ;;  %2812 = vmatprep.mubr.msk.f32.mxu1 %vm3344_vm4, %v3345_v8 }
  0x17   :  { %3060 = vmatprep.subr.bf16.mxu0 %v3342_v0 }
  0x19   :  { %3059 = vmatpush3.bf16.msra.mxu1 %v3455_v21 }
  0x1a   :  { %3066 = vmatprep.subr.bf16.mxu1 %v3342_v0 }
  0xdb   :  { %v2759_v27 = vpop.f32.mrb[0].mxu0 }
  0xdc   :  { %v114_v28 = vpop.f32.mrb[1].mxu0  ;;  %v3499_v30 = vadd.f32 %v2759_v27, %v2570_v26 }
  0xdd   :  { %v3497_v29 = vadd.f32 %v2570_v26, %v114_v28 }
  0xdf   :  { %v206_v31 = vpop.f32.mrb[0].mxu1 }
  0xe0   :  { %v357_v32 = vrot.slane %v206_v31, 1  ;;  %v360_v33 = vadd.f32 %v206_v31, %v3497_v29  ;;  %v2770_v34 = vpop.f32.mrb[1].mxu1 }
  0xe2   :  { %v361_v35 = vadd.f32 %v357_v32, %v3499_v30  ;;  %v2575_v36 = vmul.f32 -1.442695, %v360_v33 }
  0xe3   :  { %v276_v37 = vpop.f32.mrb[2].mxu0 }
  0xe4   :  { %3181 = vpow2.f32 %v2575_v36  ;;  %v2576_v38 = vmul.f32 -1.442695, %v361_v35  ;;  %v375_v39 = vrot.slane %v276_v37, 1  ;;  %v2781_v40 = vpop.f32.mrb[3].mxu0 }
  0xe6   :  { %3183 = vpow2.f32 %v2576_v38  ;;  %378 = vrot.lane.b32.xlu1 %v375_v39, %s3346_s5 }
  0xe7   :  { %v352_v41 = vpop.f32.mrb[2].mxu1 }
  0xe8   :  { %v2792_v42 = vpop.f32.mrb[3].mxu1  ;;  %v353_v48 = vadd.f32 %v3508_v47, %v352_v41 }
  0xea   :  { %376 = vrot.lane.b32.xlu1 %v276_v37, %s3346_s5  ;;  %v397_v49 = vrot.slane %v353_v48, 1 }
  0xee   :  { %v3182_v43 = vpop.eup %3181 }
  0xef   :  { %v368_v44 = vadd.f32 1.0, %v3182_v43 }
  0xf0   :  { %v3184_v45 = vpop.eup %3183 }
  0xf1   :  { %v369_v46 = vadd.f32 1.0, %v3184_v45  ;;  %3185 = vrcp.f32 %v368_v44 }
  0xf3   :  { %3187 = vrcp.f32 %v369_v46 }
  0xfb   :  { %v3186_v50 = vpop.eup %3185 }
  0xfc   :  { %v400_v51 = vmul.f32 %v3186_v50, %v353_v48 }
  0xfd   :  { %v3188_v52 = vpop.eup %3187 }
  0xfe   :  { %v401_v53 = vmul.f32 %v3188_v52, %v397_v49 }
 0x100   :  { %406 = vrot.lane.b32.xlu0 %v401_v53, %s3347_s9 }
 0x104   :  { %404 = vrot.lane.b32.xlu0 %v400_v51, %s3347_s9 }
 0x158   :  { %v379_v60 = vpop.permute.xlu1 %378 }
 0x159   :  { %v383_v61 = vadd.f32 %v379_v60, %v3499_v30 }
 0x15b   :  { %v2578_v63 = vmul.f32 -1.442695, %v383_v61 }
 0x15c   :  { %v377_v62 = vpop.permute.xlu1 %376 }
 0x15d   :  { %v382_v1 = vadd.f32 %v377_v62, %v3497_v29 }
 0x15f   :  { %v2577_v2 = vmul.f32 -1.442695, %v382_v1 }
 0x172   :  { %v407_v54 = vpop.permute.xlu0 %406 }
 0x173   :  { %v411_v55 = vadd.f32 %v407_v54, %v3499_v30 }
 0x175   :  { %3189 = vtanh.f32 %v411_v55 }
 0x176   :  { %v405_v56 = vpop.permute.xlu0 %404 }
 0x177   :  { %v410_v57 = vadd.f32 %v405_v56, %v3497_v29 }
 0x179   :  { %3191 = vtanh.f32 %v410_v57 }
 0x17a   :  { %3193 = vpow2.f32 %v2578_v63 }
 0x17b   :  { %3195 = vpow2.f32 %v2577_v2 }
 0x17f   :  { %v3190_v58 = vpop.eup %3189 }
 0x180   :  { %420 = vrot.lane.b32.xlu0 %v3190_v58, %s3348_s10 }
 0x183   :  { %v3192_v59 = vpop.eup %3191 }
 0x184   :  { %418 = vrot.lane.b32.xlu1 %v3192_v59, %s3348_s10  ;;  %v3194_v3 = vpop.eup %3193 }
 0x185   :  { %v391_v4 = vadd.f32 1.0, %v3194_v3  ;;  %v3196_v5 = vpop.eup %3195 }
 0x186   :  { %v390_v6 = vadd.f32 1.0, %v3196_v5 }
 0x187   :  { %3197 = vrcp.f32 %v391_v4 }
 0x188   :  { %3199 = vrcp.f32 %v390_v6 }
 0x191   :  { %v3198_v7 = vpop.eup %3197 }
 0x192   :  { %v415_v10 = vsub.f32 1.0, %v3198_v7  ;;  %v3200_v11 = vpop.eup %3199  ;;  %v427_v13 = vmul.f32 0.0, %v3198_v7 }
 0x193   :  { %v414_v18 = vsub.f32 1.0, %v3200_v11  ;;  %v426_v20 = vmul.f32 0.0, %v3200_v11 }
 0x1f2   :  { %v421_v12 = vpop.permute.xlu0 %420 }
 0x1f3   :  { %v425_v14 = vmul.f32 %v421_v12, %v415_v10 }
 0x1f5   :  { %v3519_v17 = vadd.f32 %v427_v13, %v425_v14 }
 0x1f6   :  { %v419_v19 = vpop.permute.xlu1 %418 }
 0x1f7   :  { %v424_v23 = vmul.f32 %v419_v19, %v414_v18  ;;  %v432_v24 = vrot.slane %v3519_v17, 7 }
 0x1f9   :  { %v3522_v26 = vadd.f32 %v426_v20, %v424_v23 }
 0x1fb   :  { %v434_v27 = vsel %vm433_vm5, %v432_v24, %v3522_v26  ;;  %v719_v12 = vrot.slane %v3522_v26, 7 }
 0x1fc   :  { %435 = vrot.lane.b32.xlu0 %v434_v27, %s3348_s10 }
 0x26e   :  { %v3529_v28 = vpop.permute.xlu0 %435 }
 0x26f   :  { %2802 = vmatmul.mubr.msk.f32.vlgmr.msra.gmra.mrb[4].mxu0 %vm136_vm6, %v3529_v28  ;;  %2813 = vmatmul.mubr.msk.f32.vlgmr.msra.gmra.mrb[4].mxu1 %vm136_vm6, %v3529_v28 }
 0x270   :  { %3062 = vmatpush3.bf16.msra.mxu0 %v3457_v22  ;;  %2823 = vmatprep.mubr.msk.f32.mxu0 %vm3344_vm4, %v3345_v8 }
 0x271   :  { %3063 = vmatprep.subr.bf16.mxu0 %v3342_v0  ;;  %3068 = vmatpush3.bf16.msra.mxu1 %v3411_v9 }
 0x272   :  { %3069 = vmatprep.subr.bf16.mxu1 %v3342_v0  ;;  %2834 = vmatprep.mubr.msk.f32.mxu1 %vm3344_vm4, %v3345_v8 }
 0x274   :  { %3065 = vmatpush3.bf16.msra.mxu0 %v3472_v25 }
 0x275   :  { %3072 = vmatprep.subr.bf16.mxu0 %v3342_v0  ;;  %3071 = vmatpush3.bf16.msra.mxu1 %v3434_v15 }
 0x276   :  { %3078 = vmatprep.subr.bf16.mxu1 %v3342_v0 }
 0x277   :  { %2824 = vmatmul.mubr.msk.f32.vlgmr.msra.gmra.mrb[6].mxu0 %vm136_vm6, %v3529_v28 }
 0x278   :  { %3074 = vmatpush3.bf16.msra.mxu0 %v3436_v16  ;;  %2845 = vmatprep.mubr.msk.f32.mxu0 %vm3344_vm4, %v3345_v8 }
 0x279   :  { %3075 = vmatprep.subr.bf16.mxu0 %v3342_v0 }
 0x27c   :  { %3077 = vmatpush3.bf16.msra.mxu0 %v3455_v21 }
 0x27d   :  { %3084 = vmatprep.subr.bf16.mxu0 %v3342_v0 }
 0x342   :  { %v505_v31 = vpop.f32.mrb[4].mxu0  ;;  %v575_v32 = vpop.f32.mrb[4].mxu1 }
 0x343   :  { %v650_v33 = vrot.slane %v505_v31, 7  ;;  %v654_v34 = vadd.f32 %v505_v31, %v3499_v30  ;;  %v2803_v35 = vpop.f32.mrb[5].mxu0  ;;  %v2814_v36 = vpop.f32.mrb[5].mxu1  ;;  %v668_v53 = vrot.slane %v575_v32, 7 }
 0x345   :  { %v653_v37 = vadd.f32 %v650_v33, %v3497_v29  ;;  %v2583_v38 = vmul.f32 -1.442695, %v654_v34 }
 0x347   :  { %v2582_v39 = vmul.f32 -1.442695, %v653_v37  ;;  %3201 = vpow2.f32 %v2583_v38 }
 0x349   :  { %3203 = vpow2.f32 %v2582_v39 }
 0x34a   :  { %v645_v40 = vpop.f32.mrb[6].mxu0 }
 0x34b   :  { %v2825_v41 = vpop.f32.mrb[7].mxu0  ;;  %v646_v46 = vadd.f32 %v3508_v47, %v645_v40 }
 0x34d   :  { %v690_v49 = vrot.slane %v646_v46, 7 }
 0x351   :  { %v3202_v42 = vpop.eup %3201 }
 0x352   :  { %v662_v43 = vadd.f32 1.0, %v3202_v42 }
 0x353   :  { %v3204_v44 = vpop.eup %3203 }
 0x354   :  { %v661_v45 = vadd.f32 1.0, %v3204_v44  ;;  %3205 = vrcp.f32 %v662_v43 }
 0x356   :  { %3207 = vrcp.f32 %v661_v45 }
 0x35e   :  { %v3206_v48 = vpop.eup %3205 }
 0x35f   :  { %v694_v50 = vmul.f32 %v3206_v48, %v646_v46 }
 0x360   :  { %v3208_v51 = vpop.eup %3207 }
 0x361   :  { %699 = vrot.lane.b32.xlu0 %v694_v50, %s3347_s9  ;;  %v693_v52 = vmul.f32 %v3208_v51, %v690_v49 }
 0x363   :  { %697 = vrot.lane.b32.xlu1 %v693_v52, %s3347_s9 }
 0x365   :  { %671 = vrot.lane.b32.xlu0 %v575_v32, %s3346_s5 }
 0x367   :  { %669 = vrot.lane.b32.xlu1 %v668_v53, %s3346_s5 }
 0x3d3   :  { %v700_v54 = vpop.permute.xlu0 %699 }
 0x3d4   :  { %v704_v55 = vadd.f32 %v700_v54, %v3499_v30 }
 0x3d5   :  { %v698_v56 = vpop.permute.xlu1 %697 }
 0x3d6   :  { %3209 = vtanh.f32 %v704_v55  ;;  %v703_v57 = vadd.f32 %v698_v56, %v3497_v29 }
 0x3d7   :  { %v672_v60 = vpop.permute.xlu0 %671 }
 0x3d8   :  { %3211 = vtanh.f32 %v703_v57  ;;  %v676_v62 = vadd.f32 %v672_v60, %v3499_v30 }
 0x3d9   :  { %v670_v61 = vpop.permute.xlu1 %669 }
 0x3da   :  { %v675_v63 = vadd.f32 %v670_v61, %v3497_v29  ;;  %v2585_v1 = vmul.f32 -1.442695, %v676_v62 }
 0x3dc   :  { %v2584_v2 = vmul.f32 -1.442695, %v675_v63  ;;  %3213 = vpow2.f32 %v2585_v1 }
 0x3de   :  { %3215 = vpow2.f32 %v2584_v2 }
 0x3e0   :  { %v3210_v58 = vpop.eup %3209 }
 0x3e1   :  { %713 = vrot.lane.b32.xlu0 %v3210_v58, %s3348_s10 }
 0x3e2   :  { %v3212_v59 = vpop.eup %3211 }
 0x3e3   :  { %711 = vrot.lane.b32.xlu1 %v3212_v59, %s3348_s10 }
 0x3e6   :  { %v3214_v3 = vpop.eup %3213 }
 0x3e7   :  { %v684_v5 = vadd.f32 1.0, %v3214_v3 }
 0x3e8   :  { %v3216_v4 = vpop.eup %3215 }
 0x3e9   :  { %v683_v6 = vadd.f32 1.0, %v3216_v4  ;;  %3217 = vrcp.f32 %v684_v5 }
 0x3eb   :  { %3219 = vrcp.f32 %v683_v6 }
 0x3f3   :  { %v3218_v7 = vpop.eup %3217 }
 0x3f4   :  { %v708_v13 = vsub.f32 1.0, %v3218_v7  ;;  %v723_v27 = vmul.f32 %v3218_v7, %v432_v24 }
 0x3f5   :  { %v3220_v10 = vpop.eup %3219 }
 0x3f6   :  { %v707_v14 = vsub.f32 1.0, %v3220_v10  ;;  %v722_v20 = vmul.f32 %v3220_v10, %v719_v12 }
 0x453   :  { %v714_v11 = vpop.permute.xlu0 %713 }
 0x454   :  { %v718_v19 = vmul.f32 %v714_v11, %v708_v13 }
 0x455   :  { %v712_v18 = vpop.permute.xlu1 %711 }
 0x456   :  { %v717_v23 = vmul.f32 %v712_v18, %v707_v14  ;;  %v3573_v32 = vadd.f32 %v723_v27, %v718_v19 }
 0x458   :  { %v3571_v31 = vadd.f32 %v722_v20, %v717_v23  ;;  %v1018_v23 = vrot.slane %v3573_v32, 7 }
 0x45a   :  { %v728_v33 = vrot.slane %v3571_v31, 1  ;;  %v1017_v19 = vrot.slane %v3571_v31, 7 }
 0x45c   :  { %v3578_v34 = vsel %vm433_vm5, %v3573_v32, %v728_v33 }
 0x45d   :  { %730 = vrot.lane.b32.xlu1 %v3578_v34, %s3348_s10 }
 0x4cf   :  { %v731_v26 = vpop.permute.xlu1 %730 }
 0x4d0   :  { %2835 = vmatmul.mubr.msk.f32.vlgmr.msra.gmra.mrb[6].mxu1 %vm136_vm6, %v731_v26  ;;  %2846 = vmatmul.mubr.msk.f32.vlgmr.msra.gmra.mrb[8].mxu0 %vm136_vm6, %v731_v26 }
 0x4d1   :  { %3080 = vmatpush3.bf16.msra.mxu1 %v3457_v22  ;;  %2856 = vmatprep.mubr.msk.f32.mxu1 %vm3344_vm4, %v3345_v8 }
 0x4d2   :  { %3081 = vmatprep.subr.bf16.mxu1 %v3342_v0  ;;  %3086 = vmatpush3.bf16.msra.mxu0 %v3411_v9 }
 0x4d3   :  { %3087 = vmatprep.subr.bf16.mxu0 %v3342_v0  ;;  %2867 = vmatprep.mubr.msk.f32.mxu0 %vm3344_vm4, %v3345_v8 }
 0x4d5   :  { %3083 = vmatpush3.bf16.msra.mxu1 %v3472_v25 }
 0x4d6   :  { %3090 = vmatprep.subr.bf16.mxu1 %v3342_v0  ;;  %3089 = vmatpush3.bf16.msra.mxu0 %v3434_v15 }
 0x4d7   :  { %3096 = vmatprep.subr.bf16.mxu0 %v3342_v0 }
 0x4d8   :  { %2857 = vmatmul.mubr.msk.f32.vlgmr.msra.gmra.mrb[8].mxu1 %vm136_vm6, %v731_v26 }
 0x4d9   :  { %3092 = vmatpush3.bf16.msra.mxu1 %v3436_v16  ;;  %2878 = vmatprep.mubr.msk.f32.mxu1 %vm3344_vm4, %v3345_v8 }
 0x4da   :  { %3093 = vmatprep.subr.bf16.mxu1 %v3342_v0 }
 0x4dd   :  { %3095 = vmatpush3.bf16.msra.mxu1 %v3455_v21 }
 0x4de   :  { %3102 = vmatprep.subr.bf16.mxu1 %v3342_v0 }
 0x5a3   :  { %v800_v17 = vpop.f32.mrb[6].mxu1  ;;  %v870_v24 = vpop.f32.mrb[8].mxu0 }
 0x5a4   :  { %v945_v35 = vrot.slane %v800_v17, 6  ;;  %v946_v36 = vrot.slane %v800_v17, 7  ;;  %v2836_v37 = vpop.f32.mrb[7].mxu1  ;;  %v2847_v38 = vpop.f32.mrb[9].mxu0  ;;  %v964_v57 = vrot.slane %v870_v24, 6  ;;  %v965_v58 = vrot.slane %v870_v24, 7 }
 0x5a6   :  { %v949_v39 = vadd.f32 %v945_v35, %v3497_v29  ;;  %v950_v40 = vadd.f32 %v946_v36, %v3499_v30 }
 0x5a8   :  { %v2589_v41 = vmul.f32 -1.442695, %v949_v39  ;;  %v2590_v42 = vmul.f32 -1.442695, %v950_v40 }
 0x5aa   :  { %3221 = vpow2.f32 %v2589_v41 }
 0x5ab   :  { %3223 = vpow2.f32 %v2590_v42  ;;  %v940_v43 = vpop.f32.mrb[8].mxu1 }
 0x5ac   :  { %v2858_v44 = vpop.f32.mrb[9].mxu1  ;;  %v941_v50 = vadd.f32 %v3508_v47, %v940_v43 }
 0x5ae   :  { %v987_v51 = vrot.slane %v941_v50, 6  ;;  %v988_v53 = vrot.slane %v941_v50, 7 }
 0x5b4   :  { %v3222_v45 = vpop.eup %3221 }
 0x5b5   :  { %v3224_v46 = vpop.eup %3223  ;;  %v957_v48 = vadd.f32 1.0, %v3222_v45 }
 0x5b6   :  { %v958_v49 = vadd.f32 1.0, %v3224_v46 }
 0x5b7   :  { %3225 = vrcp.f32 %v957_v48 }
 0x5b8   :  { %3227 = vrcp.f32 %v958_v49 }
 0x5c1   :  { %v3226_v52 = vpop.eup %3225 }
 0x5c2   :  { %v3228_v54 = vpop.eup %3227  ;;  %v991_v55 = vmul.f32 %v3226_v52, %v987_v51 }
 0x5c3   :  { %v992_v56 = vmul.f32 %v3228_v54, %v988_v53 }
 0x5c4   :  { %995 = vrot.lane.b32.xlu0 %v991_v55, %s3347_s9 }
 0x5c5   :  { %997 = vrot.lane.b32.xlu1 %v992_v56, %s3347_s9 }
 0x5c8   :  { %966 = vrot.lane.b32.xlu0 %v964_v57, %s3346_s5 }
 0x5c9   :  { %968 = vrot.lane.b32.xlu1 %v965_v58, %s3346_s5 }
 0x636   :  { %v996_v59 = vpop.permute.xlu0 %995 }
 0x637   :  { %v998_v60 = vpop.permute.xlu1 %997  ;;  %v1001_v61 = vadd.f32 %v996_v59, %v3497_v29 }
 0x638   :  { %v1002_v62 = vadd.f32 %v998_v60, %v3499_v30 }
 0x639   :  { %3229 = vtanh.f32 %v1001_v61 }
 0x63a   :  { %3231 = vtanh.f32 %v1002_v62  ;;  %v967_v2 = vpop.permute.xlu0 %966 }
 0x63b   :  { %v969_v3 = vpop.permute.xlu1 %968  ;;  %v972_v4 = vadd.f32 %v967_v2, %v3497_v29 }
 0x63c   :  { %v973_v5 = vadd.f32 %v969_v3, %v3499_v30 }
 0x63d   :  { %v2591_v6 = vmul.f32 -1.442695, %v972_v4 }
 0x63e   :  { %v2592_v7 = vmul.f32 -1.442695, %v973_v5 }
 0x63f   :  { %3233 = vpow2.f32 %v2591_v6 }
 0x640   :  { %3235 = vpow2.f32 %v2592_v7 }
 0x643   :  { %v3230_v63 = vpop.eup %3229 }
 0x644   :  { %v3232_v1 = vpop.eup %3231  ;;  %1009 = vrot.lane.b32.xlu0 %v3230_v63, %s3348_s10 }
 0x645   :  { %1011 = vrot.lane.b32.xlu1 %v3232_v1, %s3348_s10 }
 0x649   :  { %v3234_v10 = vpop.eup %3233 }
 0x64a   :  { %v3236_v11 = vpop.eup %3235  ;;  %v980_v12 = vadd.f32 1.0, %v3234_v10 }
 0x64b   :  { %v981_v13 = vadd.f32 1.0, %v3236_v11 }
 0x64c   :  { %3237 = vrcp.f32 %v980_v12 }
 0x64d   :  { %3239 = vrcp.f32 %v981_v13 }
 0x656   :  { %v3238_v14 = vpop.eup %3237 }
 0x657   :  { %v3240_v18 = vpop.eup %3239  ;;  %v1005_v20 = vsub.f32 1.0, %v3238_v14  ;;  %v1021_v17 = vmul.f32 %v3238_v14, %v1017_v19 }
 0x658   :  { %v1006_v27 = vsub.f32 1.0, %v3240_v18  ;;  %v1022_v35 = vmul.f32 %v3240_v18, %v1018_v23 }
 0x6b6   :  { %v1010_v33 = vpop.permute.xlu0 %1009 }
 0x6b7   :  { %v1012_v26 = vpop.permute.xlu1 %1011  ;;  %v1015_v24 = vmul.f32 %v1010_v33, %v1005_v20 }
 0x6b8   :  { %v1016_v36 = vmul.f32 %v1012_v26, %v1006_v27 }
 0x6b9   :  { %v3618_v37 = vadd.f32 %v1021_v17, %v1015_v24 }
 0x6ba   :  { %v3620_v38 = vadd.f32 %v1022_v35, %v1016_v36 }
 0x6bb   :  { %v1027_v39 = vrot.slane %v3618_v37, 2  ;;  %v1317_v35 = vrot.slane %v3618_v37, 7 }
 0x6bc   :  { %v1028_v40 = vrot.slane %v3620_v38, 1 }
 0x6be   :  { %v3625_v31 = vsel %vm433_vm5, %v1028_v40, %v1027_v39  ;;  %v1318_v39 = vrot.slane %v3620_v38, 7 }
 0x6bf   :  { %1030 = vrot.lane.b32.xlu0 %v3625_v31, %s3348_s10 }
 0x731   :  { %v1031_v32 = vpop.permute.xlu0 %1030 }
 0x732   :  { %2868 = vmatmul.mubr.msk.f32.vlgmr.msra.gmra.mrb[10].mxu0 %vm136_vm6, %v1031_v32  ;;  %2879 = vmatmul.mubr.msk.f32.vlgmr.msra.gmra.mrb[10].mxu1 %vm136_vm6, %v1031_v32 }
 0x733   :  { %3098 = vmatpush3.bf16.msra.mxu0 %v3457_v22  ;;  %2889 = vmatprep.mubr.msk.f32.mxu0 %vm3344_vm4, %v3345_v8 }
 0x734   :  { %3099 = vmatprep.subr.bf16.mxu0 %v3342_v0  ;;  %3104 = vmatpush3.bf16.msra.mxu1 %v3411_v9 }
 0x735   :  { %3105 = vmatprep.subr.bf16.mxu1 %v3342_v0  ;;  %2900 = vmatprep.mubr.msk.f32.mxu1 %vm3344_vm4, %v3345_v8 }
 0x737   :  { %3101 = vmatpush3.bf16.msra.mxu0 %v3472_v25 }
 0x738   :  { %3108 = vmatprep.subr.bf16.mxu0 %v3342_v0  ;;  %3107 = vmatpush3.bf16.msra.mxu1 %v3434_v15 }
 0x739   :  { %3114 = vmatprep.subr.bf16.mxu1 %v3342_v0 }
 0x73a   :  { %2890 = vmatmul.mubr.msk.f32.vlgmr.msra.gmra.mrb[12].mxu0 %vm136_vm6, %v1031_v32 }
 0x73b   :  { %3110 = vmatpush3.bf16.msra.mxu0 %v3436_v16  ;;  %2911 = vmatprep.mubr.msk.f32.mxu0 %vm3344_vm4, %v3345_v8 }
 0x73c   :  { %3111 = vmatprep.subr.bf16.mxu0 %v3342_v0 }
 0x73f   :  { %3113 = vmatpush3.bf16.msra.mxu0 %v3455_v21 }
 0x740   :  { %3120 = vmatprep.subr.bf16.mxu0 %v3342_v0 }
 0x805   :  { %v1100_v41 = vpop.f32.mrb[10].mxu0  ;;  %v1170_v42 = vpop.f32.mrb[10].mxu1 }
 0x806   :  { %v1245_v43 = vrot.slane %v1100_v41, 5  ;;  %v1246_v44 = vrot.slane %v1100_v41, 6  ;;  %v2869_v45 = vpop.f32.mrb[11].mxu0  ;;  %v2880_v46 = vpop.f32.mrb[11].mxu1  ;;  %v1264_v2 = vrot.slane %v1170_v42, 5  ;;  %v1265_v3 = vrot.slane %v1170_v42, 6 }
 0x808   :  { %v1249_v48 = vadd.f32 %v1245_v43, %v3497_v29  ;;  %v1250_v49 = vadd.f32 %v1246_v44, %v3499_v30 }
 0x80a   :  { %v2596_v50 = vmul.f32 -1.442695, %v1249_v48  ;;  %v2597_v51 = vmul.f32 -1.442695, %v1250_v49 }
 0x80c   :  { %3241 = vpow2.f32 %v2596_v50 }
 0x80d   :  { %3243 = vpow2.f32 %v2597_v51  ;;  %v1240_v52 = vpop.f32.mrb[12].mxu0 }
 0x80e   :  { %v2891_v53 = vpop.f32.mrb[13].mxu0  ;;  %v1241_v58 = vadd.f32 %v3508_v47, %v1240_v52 }
 0x810   :  { %v1287_v59 = vrot.slane %v1241_v58, 5  ;;  %v1288_v61 = vrot.slane %v1241_v58, 6 }
 0x816   :  { %v3242_v54 = vpop.eup %3241 }
 0x817   :  { %v3244_v55 = vpop.eup %3243  ;;  %v1257_v56 = vadd.f32 1.0, %v3242_v54 }
 0x818   :  { %v1258_v57 = vadd.f32 1.0, %v3244_v55 }
 0x819   :  { %3245 = vrcp.f32 %v1257_v56 }
 0x81a   :  { %3247 = vrcp.f32 %v1258_v57 }
 0x823   :  { %v3246_v60 = vpop.eup %3245 }
 0x824   :  { %v3248_v62 = vpop.eup %3247  ;;  %v1291_v63 = vmul.f32 %v3246_v60, %v1287_v59 }
 0x825   :  { %v1292_v1 = vmul.f32 %v3248_v62, %v1288_v61 }
 0x826   :  { %1295 = vrot.lane.b32.xlu1 %v1291_v63, %s3347_s9 }
 0x827   :  { %1297 = vrot.lane.b32.xlu0 %v1292_v1, %s3347_s9 }
 0x82a   :  { %1266 = vrot.lane.b32.xlu1 %v1264_v2, %s3346_s5 }
 0x82b   :  { %1268 = vrot.lane.b32.xlu0 %v1265_v3, %s3346_s5 }
 0x898   :  { %v1296_v4 = vpop.permute.xlu1 %1295 }
 0x899   :  { %v1298_v5 = vpop.permute.xlu0 %1297  ;;  %v1301_v6 = vadd.f32 %v1296_v4, %v3497_v29 }
 0x89a   :  { %v1302_v7 = vadd.f32 %v1298_v5, %v3499_v30 }
 0x89b   :  { %3249 = vtanh.f32 %v1301_v6 }
 0x89c   :  { %3251 = vtanh.f32 %v1302_v7  ;;  %v1267_v12 = vpop.permute.xlu1 %1266 }
 0x89d   :  { %v1269_v13 = vpop.permute.xlu0 %1268  ;;  %v1272_v14 = vadd.f32 %v1267_v12, %v3497_v29 }
 0x89e   :  { %v1273_v18 = vadd.f32 %v1269_v13, %v3499_v30 }
 0x89f   :  { %v2598_v19 = vmul.f32 -1.442695, %v1272_v14 }
 0x8a0   :  { %v2599_v20 = vmul.f32 -1.442695, %v1273_v18 }
 0x8a1   :  { %3253 = vpow2.f32 %v2598_v19 }
 0x8a2   :  { %3255 = vpow2.f32 %v2599_v20 }
 0x8a5   :  { %v3250_v10 = vpop.eup %3249 }
 0x8a6   :  { %v3252_v11 = vpop.eup %3251  ;;  %1309 = vrot.lane.b32.xlu1 %v3250_v10, %s3348_s10 }
 0x8a7   :  { %1311 = vrot.lane.b32.xlu0 %v3252_v11, %s3348_s10 }
 0x8ab   :  { %v3254_v23 = vpop.eup %3253 }
 0x8ac   :  { %v3256_v27 = vpop.eup %3255  ;;  %v1280_v33 = vadd.f32 1.0, %v3254_v23 }
 0x8ad   :  { %v1281_v26 = vadd.f32 1.0, %v3256_v27 }
 0x8ae   :  { %3257 = vrcp.f32 %v1280_v33 }
 0x8af   :  { %3259 = vrcp.f32 %v1281_v26 }
 0x8b8   :  { %v3258_v17 = vpop.eup %3257 }
 0x8b9   :  { %v3260_v24 = vpop.eup %3259  ;;  %v1305_v36 = vsub.f32 1.0, %v3258_v17  ;;  %v1321_v42 = vmul.f32 %v3258_v17, %v1317_v35 }
 0x8ba   :  { %v1306_v40 = vsub.f32 1.0, %v3260_v24  ;;  %v1322_v44 = vmul.f32 %v3260_v24, %v1318_v39 }
 0x918   :  { %v1310_v32 = vpop.permute.xlu1 %1309 }
 0x919   :  { %v1312_v41 = vpop.permute.xlu0 %1311  ;;  %v1315_v43 = vmul.f32 %v1310_v32, %v1305_v36 }
 0x91a   :  { %v1316_v45 = vmul.f32 %v1312_v41, %v1306_v40 }
 0x91b   :  { %v3665_v46 = vadd.f32 %v1321_v42, %v1315_v43 }
 0x91c   :  { %v3667_v48 = vadd.f32 %v1322_v44, %v1316_v45 }
 0x91d   :  { %v1327_v49 = vrot.slane %v3665_v46, 3  ;;  %v1617_v45 = vrot.slane %v3665_v46, 7 }
 0x91e   :  { %v1328_v50 = vrot.slane %v3667_v48, 2 }
 0x920   :  { %v3672_v37 = vsel %vm433_vm5, %v1328_v50, %v1327_v49  ;;  %v1618_v50 = vrot.slane %v3667_v48, 7 }
 0x921   :  { %1330 = vrot.lane.b32.xlu1 %v3672_v37, %s3348_s10 }
 0x993   :  { %v1331_v38 = vpop.permute.xlu1 %1330 }
 0x994   :  { %2901 = vmatmul.mubr.msk.f32.vlgmr.msra.gmra.mrb[12].mxu1 %vm136_vm6, %v1331_v38  ;;  %2912 = vmatmul.mubr.msk.f32.vlgmr.msra.gmra.mrb[14].mxu0 %vm136_vm6, %v1331_v38 }
 0x995   :  { %3116 = vmatpush3.bf16.msra.mxu1 %v3457_v22  ;;  %2922 = vmatprep.mubr.msk.f32.mxu1 %vm3344_vm4, %v3345_v8 }
 0x996   :  { %3117 = vmatprep.subr.bf16.mxu1 %v3342_v0  ;;  %3122 = vmatpush3.bf16.msra.mxu0 %v3411_v9 }
 0x997   :  { %3123 = vmatprep.subr.bf16.mxu0 %v3342_v0  ;;  %2933 = vmatprep.mubr.msk.f32.mxu0 %vm3344_vm4, %v3345_v8 }
 0x999   :  { %3119 = vmatpush3.bf16.msra.mxu1 %v3472_v25 }
 0x99a   :  { %3126 = vmatprep.subr.bf16.mxu1 %v3342_v0  ;;  %3125 = vmatpush3.bf16.msra.mxu0 %v3434_v15 }
 0x99b   :  { %3132 = vmatprep.subr.bf16.mxu0 %v3342_v0 }
 0x99c   :  { %2923 = vmatmul.mubr.msk.f32.vlgmr.msra.gmra.mrb[14].mxu1 %vm136_vm6, %v1331_v38 }
 0x99d   :  { %3128 = vmatpush3.bf16.msra.mxu1 %v3436_v16  ;;  %2944 = vmatprep.mubr.msk.f32.mxu1 %vm3344_vm4, %v3345_v8 }
 0x99e   :  { %3129 = vmatprep.subr.bf16.mxu1 %v3342_v0 }
 0x9a1   :  { %3131 = vmatpush3.bf16.msra.mxu1 %v3455_v21 }
 0x9a2   :  { %3138 = vmatprep.subr.bf16.mxu1 %v3342_v0 }
 0xa67   :  { %v1400_v51 = vpop.f32.mrb[12].mxu1  ;;  %v1470_v52 = vpop.f32.mrb[14].mxu0 }
 0xa68   :  { %v1545_v53 = vrot.slane %v1400_v51, 4  ;;  %v1546_v54 = vrot.slane %v1400_v51, 5  ;;  %v2902_v55 = vpop.f32.mrb[13].mxu1  ;;  %v2913_v56 = vpop.f32.mrb[15].mxu0  ;;  %v1564_v13 = vrot.slane %v1470_v52, 4  ;;  %v1565_v14 = vrot.slane %v1470_v52, 5 }
 0xa6a   :  { %v1549_v57 = vadd.f32 %v1545_v53, %v3497_v29  ;;  %v1550_v58 = vadd.f32 %v1546_v54, %v3499_v30 }
 0xa6c   :  { %v2603_v59 = vmul.f32 -1.442695, %v1549_v57  ;;  %v2604_v60 = vmul.f32 -1.442695, %v1550_v58 }
 0xa6e   :  { %3261 = vpow2.f32 %v2603_v59 }
 0xa6f   :  { %3263 = vpow2.f32 %v2604_v60  ;;  %v1540_v61 = vpop.f32.mrb[14].mxu1 }
 0xa70   :  { %v2924_v62 = vpop.f32.mrb[15].mxu1  ;;  %v1541_v4 = vadd.f32 %v3508_v47, %v1540_v61 }
 0xa72   :  { %v1587_v5 = vrot.slane %v1541_v4, 4  ;;  %v1588_v7 = vrot.slane %v1541_v4, 5 }
 0xa78   :  { %v3262_v63 = vpop.eup %3261 }
 0xa79   :  { %v3264_v1 = vpop.eup %3263  ;;  %v1557_v2 = vadd.f32 1.0, %v3262_v63 }
 0xa7a   :  { %v1558_v3 = vadd.f32 1.0, %v3264_v1 }
 0xa7b   :  { %3265 = vrcp.f32 %v1557_v2 }
 0xa7c   :  { %3267 = vrcp.f32 %v1558_v3 }
 0xa85   :  { %v3266_v6 = vpop.eup %3265 }
 0xa86   :  { %v3268_v10 = vpop.eup %3267  ;;  %v1591_v11 = vmul.f32 %v3266_v6, %v1587_v5 }
 0xa87   :  { %v1592_v12 = vmul.f32 %v3268_v10, %v1588_v7 }
 0xa88   :  { %1595 = vrot.lane.b32.xlu0 %v1591_v11, %s3347_s9 }
 0xa89   :  { %1597 = vrot.lane.b32.xlu1 %v1592_v12, %s3347_s9 }
 0xa8c   :  { %1566 = vrot.lane.b32.xlu0 %v1564_v13, %s3346_s5 }
 0xa8d   :  { %1568 = vrot.lane.b32.xlu1 %v1565_v14, %s3346_s5 }
 0xafa   :  { %v1596_v18 = vpop.permute.xlu0 %1595 }
 0xafb   :  { %v1598_v19 = vpop.permute.xlu1 %1597  ;;  %v1601_v20 = vadd.f32 %v1596_v18, %v3497_v29 }
 0xafc   :  { %v1602_v23 = vadd.f32 %v1598_v19, %v3499_v30 }
 0xafd   :  { %3269 = vtanh.f32 %v1601_v20 }
 0xafe   :  { %3271 = vtanh.f32 %v1602_v23  ;;  %v1567_v26 = vpop.permute.xlu0 %1566 }
 0xaff   :  { %v1569_v17 = vpop.permute.xlu1 %1568  ;;  %v1572_v24 = vadd.f32 %v1567_v26, %v3497_v29 }
 0xb00   :  { %v1573_v35 = vadd.f32 %v1569_v17, %v3499_v30 }
 0xb01   :  { %v2605_v36 = vmul.f32 -1.442695, %v1572_v24 }
 0xb02   :  { %v2606_v39 = vmul.f32 -1.442695, %v1573_v35 }
 0xb03   :  { %3273 = vpow2.f32 %v2605_v36 }
 0xb04   :  { %3275 = vpow2.f32 %v2606_v39 }
 0xb07   :  { %v3270_v27 = vpop.eup %3269 }
 0xb08   :  { %v3272_v33 = vpop.eup %3271  ;;  %1609 = vrot.lane.b32.xlu0 %v3270_v27, %s3348_s10 }
 0xb09   :  { %1611 = vrot.lane.b32.xlu1 %v3272_v33, %s3348_s10 }
 0xb0d   :  { %v3274_v40 = vpop.eup %3273 }
 0xb0e   :  { %v3276_v32 = vpop.eup %3275  ;;  %v1580_v41 = vadd.f32 1.0, %v3274_v40 }
 0xb0f   :  { %v1581_v42 = vadd.f32 1.0, %v3276_v32 }
 0xb10   :  { %3277 = vrcp.f32 %v1580_v41 }
 0xb11   :  { %3279 = vrcp.f32 %v1581_v42 }
 0xb1a   :  { %v3278_v43 = vpop.eup %3277 }
 0xb1b   :  { %v3280_v44 = vpop.eup %3279  ;;  %v1605_v49 = vsub.f32 1.0, %v3278_v43  ;;  %v1621_v53 = vmul.f32 %v3278_v43, %v1617_v45 }
 0xb1c   :  { %v1606_v38 = vsub.f32 1.0, %v3280_v44  ;;  %v1622_v55 = vmul.f32 %v3280_v44, %v1618_v50 }
 0xb7a   :  { %v1610_v51 = vpop.permute.xlu0 %1609 }
 0xb7b   :  { %v1612_v52 = vpop.permute.xlu1 %1611  ;;  %v1615_v54 = vmul.f32 %v1610_v51, %v1605_v49 }
 0xb7c   :  { %v1616_v56 = vmul.f32 %v1612_v52, %v1606_v38 }
 0xb7d   :  { %v3712_v57 = vadd.f32 %v1621_v53, %v1615_v54 }
 0xb7e   :  { %v3714_v58 = vadd.f32 %v1622_v55, %v1616_v56 }
 0xb7f   :  { %v1627_v59 = vrot.slane %v3712_v57, 4  ;;  %v1917_v56 = vrot.slane %v3712_v57, 7 }
 0xb80   :  { %v1628_v60 = vrot.slane %v3714_v58, 3 }
 0xb82   :  { %v1629_v46 = vsel %vm433_vm5, %v1628_v60, %v1627_v59  ;;  %v1918_v60 = vrot.slane %v3714_v58, 7 }
 0xb83   :  { %1630 = vrot.lane.b32.xlu0 %v1629_v46, %s3348_s10 }
 0xbf5   :  { %v3720_v48 = vpop.permute.xlu0 %1630 }
 0xbf6   :  { %2934 = vmatmul.mubr.msk.f32.vlgmr.msra.gmra.mrb[16].mxu0 %vm136_vm6, %v3720_v48  ;;  %2945 = vmatmul.mubr.msk.f32.vlgmr.msra.gmra.mrb[16].mxu1 %vm136_vm6, %v3720_v48 }
 0xbf7   :  { %3134 = vmatpush3.bf16.msra.mxu0 %v3457_v22  ;;  %2955 = vmatprep.mubr.msk.f32.mxu0 %vm3344_vm4, %v3345_v8 }
 0xbf8   :  { %3135 = vmatprep.subr.bf16.mxu0 %v3342_v0  ;;  %3140 = vmatpush3.bf16.msra.mxu1 %v3411_v9 }
 0xbf9   :  { %3141 = vmatprep.subr.bf16.mxu1 %v3342_v0  ;;  %2966 = vmatprep.mubr.msk.f32.mxu1 %vm3344_vm4, %v3345_v8 }
 0xbfb   :  { %3137 = vmatpush3.bf16.msra.mxu0 %v3472_v25 }
 0xbfc   :  { %3144 = vmatprep.subr.bf16.mxu0 %v3342_v0  ;;  %3143 = vmatpush3.bf16.msra.mxu1 %v3434_v15 }
 0xbfd   :  { %3150 = vmatprep.subr.bf16.mxu1 %v3342_v0 }
 0xbfe   :  { %2956 = vmatmul.mubr.msk.f32.vlgmr.msra.gmra.mrb[18].mxu0 %vm136_vm6, %v3720_v48 }
 0xbff   :  { %3146 = vmatpush3.bf16.msra.mxu0 %v3436_v16  ;;  %2977 = vmatprep.mubr.msk.f32.mxu0 %vm3344_vm4, %v3345_v8 }
 0xc00   :  { %3147 = vmatprep.subr.bf16.mxu0 %v3342_v0 }
 0xc03   :  { %3149 = vmatpush3.bf16.msra.mxu0 %v3455_v21 }
 0xc04   :  { %3156 = vmatprep.subr.bf16.mxu0 %v3342_v0 }
 0xcc9   :  { %v1700_v61 = vpop.f32.mrb[16].mxu0  ;;  %v1770_v62 = vpop.f32.mrb[16].mxu1 }
 0xcca   :  { %v1845_v63 = vrot.slane %v1700_v61, 3  ;;  %v1846_v1 = vrot.slane %v1700_v61, 4  ;;  %v2935_v2 = vpop.f32.mrb[17].mxu0  ;;  %v2946_v3 = vpop.f32.mrb[17].mxu1  ;;  %v1864_v24 = vrot.slane %v1770_v62, 3  ;;  %v1865_v35 = vrot.slane %v1770_v62, 4 }
 0xccc   :  { %v1849_v4 = vadd.f32 %v1845_v63, %v3497_v29  ;;  %v1850_v5 = vadd.f32 %v1846_v1, %v3499_v30 }
 0xcce   :  { %v2610_v6 = vmul.f32 -1.442695, %v1849_v4  ;;  %v2611_v7 = vmul.f32 -1.442695, %v1850_v5 }
 0xcd0   :  { %3281 = vpow2.f32 %v2610_v6 }
 0xcd1   :  { %3283 = vpow2.f32 %v2611_v7  ;;  %v1840_v10 = vpop.f32.mrb[18].mxu0 }
 0xcd2   :  { %v2957_v11 = vpop.f32.mrb[19].mxu0  ;;  %v1841_v19 = vadd.f32 %v3508_v47, %v1840_v10 }
 0xcd4   :  { %v1887_v20 = vrot.slane %v1841_v19, 3  ;;  %v1888_v27 = vrot.slane %v1841_v19, 4 }
 0xcda   :  { %v3282_v12 = vpop.eup %3281 }
 0xcdb   :  { %v3284_v13 = vpop.eup %3283  ;;  %v1857_v14 = vadd.f32 1.0, %v3282_v12 }
 0xcdc   :  { %v1858_v18 = vadd.f32 1.0, %v3284_v13 }
 0xcdd   :  { %3285 = vrcp.f32 %v1857_v14 }
 0xcde   :  { %3287 = vrcp.f32 %v1858_v18 }
 0xce7   :  { %v3286_v23 = vpop.eup %3285 }
 0xce8   :  { %v3288_v33 = vpop.eup %3287  ;;  %v1891_v26 = vmul.f32 %v3286_v23, %v1887_v20 }
 0xce9   :  { %v1892_v17 = vmul.f32 %v3288_v33, %v1888_v27 }
 0xcea   :  { %1895 = vrot.lane.b32.xlu1 %v1891_v26, %s3347_s9 }
 0xceb   :  { %1897 = vrot.lane.b32.xlu0 %v1892_v17, %s3347_s9  ;;  %v3797_v17 = vld [vmem:[%s3865_s6] ss:$0 sm:$0xff] }
 0xcee   :  { %1866 = vrot.lane.b32.xlu1 %v1864_v24, %s3346_s5 }
 0xcef   :  { %1868 = vrot.lane.b32.xlu0 %v1865_v35, %s3346_s5 }
 0xd5c   :  { %v1896_v36 = vpop.permute.xlu1 %1895 }
 0xd5d   :  { %v1898_v39 = vpop.permute.xlu0 %1897  ;;  %v1901_v47 = vadd.f32 %v1896_v36, %v3497_v29 }
 0xd5e   :  { %v1902_v40 = vadd.f32 %v1898_v39, %v3499_v30 }
 0xd5f   :  { %3289 = vtanh.f32 %v1901_v47 }
 0xd60   :  { %3291 = vtanh.f32 %v1902_v40  ;;  %v1867_v42 = vpop.permute.xlu1 %1866 }
 0xd61   :  { %v1869_v43 = vpop.permute.xlu0 %1868  ;;  %v1872_v44 = vadd.f32 %v1867_v42, %v3497_v29 }
 0xd62   :  { %v1873_v45 = vadd.f32 %v1869_v43, %v3499_v30 }
 0xd63   :  { %v2612_v49 = vmul.f32 -1.442695, %v1872_v44 }
 0xd64   :  { %v2613_v50 = vmul.f32 -1.442695, %v1873_v45 }
 0xd65   :  { %3293 = vpow2.f32 %v2612_v49 }
 0xd66   :  { %3295 = vpow2.f32 %v2613_v50 }
 0xd69   :  { %v3290_v32 = vpop.eup %3289 }
 0xd6a   :  { %v3292_v41 = vpop.eup %3291  ;;  %1909 = vrot.lane.b32.xlu1 %v3290_v32, %s3348_s10 }
 0xd6b   :  { %1911 = vrot.lane.b32.xlu0 %v3292_v41, %s3348_s10 }
 0xd6f   :  { %v3294_v38 = vpop.eup %3293 }
 0xd70   :  { %v3296_v51 = vpop.eup %3295  ;;  %v1880_v52 = vadd.f32 1.0, %v3294_v38 }
 0xd71   :  { %v1881_v53 = vadd.f32 1.0, %v3296_v51 }
 0xd72   :  { %3297 = vrcp.f32 %v1880_v52 }
 0xd73   :  { %3299 = vrcp.f32 %v1881_v53 }
 0xd7c   :  { %v3298_v54 = vpop.eup %3297 }
 0xd7d   :  { %v3300_v55 = vpop.eup %3299  ;;  %v1905_v59 = vsub.f32 1.0, %v3298_v54  ;;  %v1921_v63 = vmul.f32 %v3298_v54, %v1917_v56 }
 0xd7e   :  { %v1906_v46 = vsub.f32 1.0, %v3300_v55  ;;  %v1922_v2 = vmul.f32 %v3300_v55, %v1918_v60 }
 0xddc   :  { %v1910_v61 = vpop.permute.xlu1 %1909 }
 0xddd   :  { %v1912_v62 = vpop.permute.xlu0 %1911  ;;  %v1915_v1 = vmul.f32 %v1910_v61, %v1905_v59 }
 0xdde   :  { %v1916_v3 = vmul.f32 %v1912_v62, %v1906_v46 }
 0xddf   :  { %v3761_v4 = vadd.f32 %v1921_v63, %v1915_v1 }
 0xde0   :  { %v3763_v5 = vadd.f32 %v1922_v2, %v1916_v3 }
 0xde1   :  { %v1927_v6 = vrot.slane %v3761_v4, 5  ;;  %v2217_v1 = vrot.slane %v3761_v4, 7 }
 0xde2   :  { %v1928_v7 = vrot.slane %v3763_v5, 4  ;;  %v2218_v3 = vrot.slane %v3763_v5, 7 }
 0xde4   :  { %v3768_v57 = vsel %vm433_vm5, %v1928_v7, %v1927_v6 }
 0xde5   :  { %1930 = vrot.lane.b32.xlu1 %v3768_v57, %s3348_s10 }
 0xe57   :  { %v1931_v58 = vpop.permute.xlu1 %1930 }
 0xe58   :  { %2967 = vmatmul.mubr.msk.f32.vlgmr.msra.gmra.mrb[18].mxu1 %vm136_vm6, %v1931_v58  ;;  %2978 = vmatmul.mubr.msk.f32.vlgmr.msra.gmra.mrb[20].mxu0 %vm136_vm6, %v1931_v58 }
 0xe59   :  { %3152 = vmatpush3.bf16.msra.mxu1 %v3457_v22  ;;  %2988 = vmatprep.mubr.msk.f32.mxu1 %vm3344_vm4, %v3345_v8 }
 0xe5a   :  { %3153 = vmatprep.subr.bf16.mxu1 %v3342_v0  ;;  %3158 = vmatpush3.bf16.msra.mxu0 %v3411_v9 }
 0xe5b   :  { %3159 = vmatprep.subr.bf16.mxu0 %v3342_v0  ;;  %2999 = vmatprep.mubr.msk.f32.mxu0 %vm3344_vm4, %v3345_v8 }
 0xe5d   :  { %3155 = vmatpush3.bf16.msra.mxu1 %v3472_v25 }
 0xe5e   :  { %3162 = vmatprep.subr.bf16.mxu1 %v3342_v0  ;;  %3161 = vmatpush3.bf16.msra.mxu0 %v3434_v15 }
 0xe5f   :  { %3168 = vmatprep.subr.bf16.mxu0 %v3342_v0 }
 0xe60   :  { %2989 = vmatmul.mubr.msk.f32.vlgmr.msra.gmra.mrb[20].mxu1 %vm136_vm6, %v1931_v58 }
 0xe61   :  { %3164 = vmatpush3.bf16.msra.mxu1 %v3436_v16  ;;  %3010 = vmatprep.mubr.msk.f32.mxu1 %vm3344_vm4, %v3345_v8 }
 0xe62   :  { %3165 = vmatprep.subr.bf16.mxu1 %v3342_v0 }
 0xe65   :  { %3167 = vmatpush3.bf16.msra.mxu1 %v3455_v21 }
 0xf2b   :  { %v2000_v9 = vpop.f32.mrb[18].mxu1  ;;  %v2070_v10 = vpop.f32.mrb[20].mxu0 }
 0xf2c   :  { %v2145_v11 = vrot.slane %v2000_v9, 2  ;;  %v2146_v12 = vrot.slane %v2000_v9, 3  ;;  %v2968_v13 = vpop.f32.mrb[19].mxu1  ;;  %v2979_v14 = vpop.f32.mrb[21].mxu0  ;;  %v2164_v41 = vrot.slane %v2070_v10, 2  ;;  %v2165_v42 = vrot.slane %v2070_v10, 3 }
 0xf2e   :  { %v2149_v15 = vadd.f32 %v2145_v11, %v3497_v29  ;;  %v2150_v18 = vadd.f32 %v2146_v12, %v3499_v30 }
 0xf30   :  { %v2617_v19 = vmul.f32 -1.442695, %v2149_v15  ;;  %v2618_v20 = vmul.f32 -1.442695, %v2150_v18 }
 0xf32   :  { %3301 = vpow2.f32 %v2617_v19 }
 0xf33   :  { %3303 = vpow2.f32 %v2618_v20  ;;  %v2140_v16 = vpop.f32.mrb[20].mxu1 }
 0xf34   :  { %v2990_v23 = vpop.f32.mrb[21].mxu1  ;;  %v2141_v24 = vadd.f32 %v3797_v17, %v2140_v16 }
 0xf36   :  { %v2187_v35 = vrot.slane %v2141_v24, 2  ;;  %v2188_v39 = vrot.slane %v2141_v24, 3 }
 0xf3c   :  { %v3302_v27 = vpop.eup %3301 }
 0xf3d   :  { %v3304_v33 = vpop.eup %3303  ;;  %v2157_v26 = vadd.f32 1.0, %v3302_v27 }
 0xf3e   :  { %v2158_v21 = vadd.f32 1.0, %v3304_v33 }
 0xf3f   :  { %3305 = vrcp.f32 %v2157_v26 }
 0xf40   :  { %3307 = vrcp.f32 %v2158_v21 }
 0xf49   :  { %v3306_v36 = vpop.eup %3305 }
 0xf4a   :  { %v3308_v47 = vpop.eup %3307  ;;  %v2191_v40 = vmul.f32 %v3306_v36, %v2187_v35 }
 0xf4b   :  { %v2192_v32 = vmul.f32 %v3308_v47, %v2188_v39 }
 0xf4c   :  { %2195 = vrot.lane.b32.xlu0 %v2191_v40, %s3347_s9 }
 0xf4d   :  { %2197 = vrot.lane.b32.xlu1 %v2192_v32, %s3347_s9 }
 0xf50   :  { %2166 = vrot.lane.b32.xlu0 %v2164_v41, %s3346_s5 }
 0xf51   :  { %2168 = vrot.lane.b32.xlu1 %v2165_v42, %s3346_s5 }
 0xfbe   :  { %v2196_v43 = vpop.permute.xlu0 %2195 }
 0xfbf   :  { %v2198_v44 = vpop.permute.xlu1 %2197  ;;  %v2201_v45 = vadd.f32 %v2196_v43, %v3497_v29 }
 0xfc0   :  { %v2202_v49 = vadd.f32 %v2198_v44, %v3499_v30 }
 0xfc1   :  { %3309 = vtanh.f32 %v2201_v45 }
 0xfc2   :  { %3311 = vtanh.f32 %v2202_v49  ;;  %v2167_v51 = vpop.permute.xlu0 %2166 }
 0xfc3   :  { %v2169_v52 = vpop.permute.xlu1 %2168  ;;  %v2172_v53 = vadd.f32 %v2167_v51, %v3497_v29 }
 0xfc4   :  { %v2173_v54 = vadd.f32 %v2169_v52, %v3499_v30 }
 0xfc5   :  { %v2619_v55 = vmul.f32 -1.442695, %v2172_v53 }
 0xfc6   :  { %v2620_v56 = vmul.f32 -1.442695, %v2173_v54 }
 0xfc7   :  { %3313 = vpow2.f32 %v2619_v55 }
 0xfc8   :  { %3315 = vpow2.f32 %v2620_v56 }
 0xfcb   :  { %v3310_v50 = vpop.eup %3309 }
 0xfcc   :  { %v3312_v38 = vpop.eup %3311  ;;  %2209 = vrot.lane.b32.xlu0 %v3310_v50, %s3348_s10 }
 0xfcd   :  { %2211 = vrot.lane.b32.xlu1 %v3312_v38, %s3348_s10 }
 0xfd1   :  { %v3314_v59 = vpop.eup %3313 }
 0xfd2   :  { %v3316_v60 = vpop.eup %3315  ;;  %v2180_v46 = vadd.f32 1.0, %v3314_v59 }
 0xfd3   :  { %v2181_v61 = vadd.f32 1.0, %v3316_v60 }
 0xfd4   :  { %3317 = vrcp.f32 %v2180_v46 }
 0xfd5   :  { %3319 = vrcp.f32 %v2181_v61 }
 0xfde   :  { %v3318_v62 = vpop.eup %3317 }
 0xfdf   :  { %v3320_v63 = vpop.eup %3319  ;;  %v2205_v2 = vsub.f32 1.0, %v3318_v62  ;;  %v2221_v9 = vmul.f32 %v3318_v62, %v2217_v1 }
 0xfe0   :  { %v2206_v6 = vsub.f32 1.0, %v3320_v63  ;;  %v2222_v11 = vmul.f32 %v3320_v63, %v2218_v3 }
0x103e   :  { %v2210_v7 = vpop.permute.xlu0 %2209 }
0x103f   :  { %v2212_v58 = vpop.permute.xlu1 %2211  ;;  %v2215_v10 = vmul.f32 %v2210_v7, %v2205_v2 }
0x1040   :  { %v2216_v12 = vmul.f32 %v2212_v58, %v2206_v6 }
0x1041   :  { %v3812_v13 = vadd.f32 %v2221_v9, %v2215_v10 }
0x1042   :  { %v3814_v14 = vadd.f32 %v2222_v11, %v2216_v12 }
0x1043   :  { %v2227_v15 = vrot.slane %v3812_v13, 6 }
0x1044   :  { %v2228_v18 = vrot.slane %v3814_v14, 5  ;;  %v2518_v6 = vrot.slane %v3814_v14, 7 }
0x1046   :  { %v2229_v4 = vsel %vm433_vm5, %v2228_v18, %v2227_v15 }
0x1047   :  { %2230 = vrot.lane.b32.xlu0 %v2229_v4, %s3348_s10 }
0x10b9   :  { %v2231_v5 = vpop.permute.xlu0 %2230 }
0x10ba   :  { %3000 = vmatmul.mubr.msk.f32.vlgmr.msra.gmra.mrb[22].mxu0 %vm136_vm6, %v2231_v5  ;;  %3011 = vmatmul.mubr.msk.f32.vlgmr.msra.gmra.mrb[22].mxu1 %vm136_vm6, %v2231_v5 }
0x10bb   :  { %3170 = vmatpush3.bf16.msra.mxu0 %v3457_v22  ;;  %3021 = vmatprep.mubr.msk.f32.mxu0 %vm3344_vm4, %v3345_v8 }
0x10bc   :  { %3171 = vmatprep.subr.bf16.mxu0 %v3342_v0 }
0x10bf   :  { %3173 = vmatpush3.bf16.msra.mxu0 %v3472_v25 }
0x10c2   :  { %3022 = vmatmul.mubr.msk.f32.vlgmr.msra.gmra.mrb[24].mxu0 %vm136_vm6, %v2231_v5 }
0x118d   :  { %v2300_v19 = vpop.f32.mrb[22].mxu0  ;;  %v2370_v20 = vpop.f32.mrb[22].mxu1 }
0x118e   :  { %v2445_v16 = vrot.slane %v2300_v19, 1  ;;  %v2446_v23 = vrot.slane %v2300_v19, 2  ;;  %v3001_v27 = vpop.f32.mrb[23].mxu0  ;;  %v3012_v33 = vpop.f32.mrb[23].mxu1  ;;  %v2464_v45 = vrot.slane %v2370_v20, 1  ;;  %v2465_v49 = vrot.slane %v2370_v20, 2 }
0x118f   :  { %v2551_v20 = vsel %vm136_vm6, %v3720_v48, %v3768_v57 }
0x1190   :  { %v2449_v26 = vadd.f32 %v2445_v16, %v3497_v29  ;;  %v2450_v21 = vadd.f32 %v2446_v23, %v3499_v30  ;;  %v2546_v16 = vsel %vm136_vm6, %v3529_v28, %v3578_v34 }
0x1192   :  { %v2624_v22 = vmul.f32 -1.442695, %v2449_v26  ;;  %v2625_v24 = vmul.f32 -1.442695, %v2450_v21 }
0x1194   :  { %3321 = vpow2.f32 %v2624_v22 }
0x1195   :  { %3323 = vpow2.f32 %v2625_v24  ;;  %v2440_v8 = vpop.f32.mrb[24].mxu0 }
0x1196   :  { %v3023_v0 = vpop.f32.mrb[25].mxu0  ;;  %v2441_v47 = vadd.f32 %v3797_v17, %v2440_v8 }
0x1198   :  { %v2487_v40 = vrot.slane %v2441_v47, 1  ;;  %v2488_v41 = vrot.slane %v2441_v47, 2 }
0x119e   :  { %v3322_v35 = vpop.eup %3321 }
0x119f   :  { %v3324_v25 = vpop.eup %3323  ;;  %v2457_v36 = vadd.f32 1.0, %v3322_v35 }
0x11a0   :  { %v2458_v39 = vadd.f32 1.0, %v3324_v25 }
0x11a1   :  { %3325 = vrcp.f32 %v2457_v36 }
0x11a2   :  { %3327 = vrcp.f32 %v2458_v39 }
0x11ab   :  { %v3326_v32 = vpop.eup %3325 }
0x11ac   :  { %v3328_v42 = vpop.eup %3327  ;;  %v2491_v43 = vmul.f32 %v3326_v32, %v2487_v40 }
0x11ad   :  { %v2492_v44 = vmul.f32 %v3328_v42, %v2488_v41 }
0x11ae   :  { %2495 = vrot.lane.b32.xlu1 %v2491_v43, %s3347_s9 }
0x11af   :  { %2497 = vrot.lane.b32.xlu0 %v2492_v44, %s3347_s9 }
0x11b2   :  { %2466 = vrot.lane.b32.xlu1 %v2464_v45, %s3346_s5 }
0x11b3   :  { %2468 = vrot.lane.b32.xlu0 %v2465_v49, %s3346_s5 }
0x1220   :  { %v2496_v50 = vpop.permute.xlu1 %2495 }
0x1221   :  { %v2498_v38 = vpop.permute.xlu0 %2497  ;;  %v2501_v17 = vadd.f32 %v2496_v50, %v3497_v29 }
0x1222   :  { %v2502_v51 = vadd.f32 %v2498_v38, %v3499_v30 }
0x1223   :  { %3329 = vtanh.f32 %v2501_v17 }
0x1224   :  { %3331 = vtanh.f32 %v2502_v51  ;;  %v2467_v54 = vpop.permute.xlu1 %2466 }
0x1225   :  { %v2469_v55 = vpop.permute.xlu0 %2468  ;;  %v2472_v56 = vadd.f32 %v2467_v54, %v3497_v29 }
0x1226   :  { %v2473_v59 = vadd.f32 %v2469_v55, %v3499_v30 }
0x1227   :  { %v2626_v60 = vmul.f32 -1.442695, %v2472_v56 }
0x1228   :  { %v2627_v46 = vmul.f32 -1.442695, %v2473_v59 }
0x1229   :  { %3333 = vpow2.f32 %v2626_v60 }
0x122a   :  { %3335 = vpow2.f32 %v2627_v46 }
0x122d   :  { %v3330_v52 = vpop.eup %3329 }
0x122e   :  { %v3332_v53 = vpop.eup %3331  ;;  %2509 = vrot.lane.b32.xlu1 %v3330_v52, %s3348_s10 }
0x122f   :  { %2511 = vrot.lane.b32.xlu0 %v3332_v53, %s3348_s10 }
0x1232   :  { %2527 = vrot.lane.b32.xlu1 %v3625_v31, %s3346_s5 }
0x1233   :  { %2535 = vrot.lane.b32.xlu0 %v2229_v4, %s3346_s5  ;;  %v3334_v61 = vpop.eup %3333 }
0x1234   :  { %v3336_v62 = vpop.eup %3335  ;;  %v2480_v63 = vadd.f32 1.0, %v3334_v61 }
0x1235   :  { %v2481_v1 = vadd.f32 1.0, %v3336_v62 }
0x1236   :  { %2530 = vrot.lane.b32.xlu1 %v3672_v37, %s3347_s9  ;;  %3337 = vrcp.f32 %v2480_v63  ;;  %v2517_v37 = vrot.slane %v3812_v13, 7 }
0x1237   :  { %3339 = vrcp.f32 %v2481_v1 }
0x1240   :  { %v3338_v31 = vpop.eup %3337 }
0x1241   :  { %v3340_v2 = vpop.eup %3339  ;;  %v2505_v3 = vsub.f32 1.0, %v3338_v31  ;;  %v2521_v58 = vmul.f32 %v3338_v31, %v2517_v37 }
0x1242   :  { %v2506_v29 = vsub.f32 1.0, %v3340_v2  ;;  %v2522_v10 = vmul.f32 %v3340_v2, %v2518_v6 }
0x12a0   :  { %v2510_v7 = vpop.permute.xlu1 %2509 }
0x12a1   :  { %v2512_v30 = vpop.permute.xlu0 %2511  ;;  %v2515_v9 = vmul.f32 %v2510_v7, %v2505_v3 }
0x12a2   :  { %v2516_v11 = vmul.f32 %v2512_v30, %v2506_v29 }
0x12a3   :  { %v2523_v12 = vadd.f32 %v2521_v58, %v2515_v9 }
0x12a4   :  { %v2524_v15 = vadd.f32 %v2522_v10, %v2516_v11  ;;  %v2528_v19 = vpop.permute.xlu1 %2527 }
0x12a5   :  { %v2540_v18 = vrot.slane %v2523_v12, 7  ;;  %v2536_v13 = vpop.permute.xlu0 %2535  ;;  %v2548_v27 = vsel %vm2547_vm7, %v2546_v16, %v2528_v19 }
0x12a6   :  { %v2541_v4 = vrot.slane %v2524_v15, 6  ;;  %v2552_v23 = vsel %vm2547_vm7, %v2551_v20, %v2536_v13 }
0x12a8   :  { %v2542_v5 = vsel %vm433_vm5, %v2541_v4, %v2540_v18  ;;  %v2531_v14 = vpop.permute.xlu1 %2530 }
0x12a9   :  { %2543 = vrot.lane.b32.xlu0 %v2542_v5, %s3347_s9  ;;  %v2550_v26 = vsel %vm2549_vm8, %v2548_v27, %v2531_v14 }
0x131b   :  { %v2544_v33 = vpop.permute.xlu0 %2543 }
0x131c   :  { %v2553_v21 = vsel %vm2549_vm8, %v2552_v23, %v2544_v33 }
0x131d   :  { %v2556_v22 = vcombine.low %v2550_v26, %v2553_v21 }
0x131f   :  { %2628 = vst.sshfl [vmem:[%s3866_s7] sm:$0x33 pattern:$0x76325410] %v2556_v22 }

</bundles_post_ra>
